<compile_context>
chip_gen: v5e
topology: v5e:2x2
jax: 0.10.0
libtpu: 0.0.40
codegen_flags: <defaults>
</compile_context>

<pallas_src>
import functools

import jax
import jax.numpy as jnp
from jax.experimental import pallas as pl
from jax.experimental.pallas import tpu as pltpu

EPS = 1e-5
LANE = 128          # channel padding granularity (use 256 to fill v6e/v7x MXU)


def _round_up(x, m):
    return (x + m - 1) // m * m


# ----------------------------- in-kernel math ------------------------------

def _erf(x):
    # Abramowitz & Stegun 7.1.26 (|err| < 1.5e-7).  Exact divide (review:
    # approx reciprocal's ~2^-12 error swamps the polynomial accuracy).
    a1, a2, a3, a4, a5 = 0.254829592, -0.284496736, 1.421413741, -1.453152027, 1.061405429
    p = 0.3275911
    sgn = jnp.where(x >= 0.0, 1.0, -1.0)
    ax = jnp.abs(x)
    t = 1.0 / (1.0 + p * ax)
    poly = ((((a5 * t + a4) * t + a3) * t + a2) * t + a1) * t
    return sgn * (1.0 - poly * jnp.exp(-ax * ax))          # exp -> EUP slot


def _gelu(x):
    # exact GELU: 0.5 * x * (1 + erf(x / sqrt(2)))  (PyTorch nn.GELU default)
    return 0.5 * x * (1.0 + _erf(x * 0.7071067811865476))


def _bn_train(y, gamma, beta):
    # training-mode BatchNorm1d on a (rows, C) tile, rows = batch * length.
    # Two-pass variance (review: single-pass E[x^2]-E[x]^2 can cancel).
    m = jnp.mean(y, axis=0, keepdims=True)
    c = y - m
    var = jnp.mean(c * c, axis=0, keepdims=True)
    return gamma * (c * jax.lax.rsqrt(var + EPS)) + beta


# ------------------------------- fused kernel -------------------------------

def _encoder_kernel(xp_hbm, w_patch_ref, pvec_ref,        # patchify inputs
                    wd_ref, wp_ref, bvec_ref,              # per-block (grid-selected)
                    out_ref,                               # pooled output (N, dim)
                    hext_ref, xp_vmem, dma_sem,            # scratch
                    *, N, Lp, dim, K, P, Pa, Pt):
    d = pl.program_id(0)
    Lext = Pa + Lp + Pt
    R = N * Lp

    # ---- step 0: DMA xp in, patchify matmul + GELU + BN, zero halo bands ----
    @pl.when(d == 0)
    def _():
        # zero only the two halo bands; the centre is overwritten below
        hext_ref[:, :Pa, :] = jnp.zeros((N, Pa, dim), jnp.float32)
        hext_ref[:, Pa + Lp:, :] = jnp.zeros((N, Pt, dim), jnp.float32)
        # xp is only needed here: single manual DMA instead of a pipelined,
        # double-buffered input held resident across the whole depth loop.
        cp = pltpu.make_async_copy(xp_hbm, xp_vmem, dma_sem)
        cp.start()
        cp.wait()
        y = jnp.dot(xp_vmem[...], w_patch_ref[...],           # bf16 x bf16 -> f32
                    preferred_element_type=jnp.float32)
        y = _gelu(y + pvec_ref[0:1, :])
        y = _bn_train(y, pvec_ref[1:2, :], pvec_ref[2:3, :])
        hext_ref[:, Pa:Pa + Lp, :] = y.reshape(N, Lp, dim)

    # ---- ConvMixer block d (activation stays resident in VMEM) ----
    hext = hext_ref[...]                                   # (N, Lext, dim) f32
    hext2 = hext.reshape(N * Lext, dim)                    # free view (Lext % 8 == 0)
    wd = wd_ref[0]                                         # (K, dim) loaded once
    vec = bvec_ref[0]                                      # (8, dim) packed vectors

    # depthwise 'same' conv: accumulate all K taps in the flattened
    # halo-extended space (roll on the XLU, multiply-add on the VPU, no
    # per-tap reshape/slice), then extract the centre once.  Halo rows are
    # zero and Pa,Pt >= max(P, K-1-P), so centre rows never receive data from
    # another batch element and no masking is needed.
    acc = hext2 * wd[P:P + 1, :]                           # k == P tap: no roll
    for k in range(K):                                     # static unroll, K small
        if k == P:
            continue
        rolled = pltpu.roll(hext2, shift=(P - k) % (N * Lext), axis=0)
        acc = acc + rolled * wd[k:k + 1, :]

    acc_c = acc.reshape(N, Lext, dim)[:, Pa:Pa + Lp, :].reshape(R, dim)
    x_mid = hext[:, Pa:Pa + Lp, :].reshape(R, dim)         # block input (residual)

    a2 = _gelu(acc_c + vec[0:1, :])
    h = _bn_train(a2, vec[1:2, :], vec[2:3, :]) + x_mid    # Residual

    # pointwise (1x1) conv == bf16 MXU matmul with f32 accumulation
    y = jnp.dot(h.astype(jnp.bfloat16), wp_ref[0],
                preferred_element_type=jnp.float32) + vec[3:4, :]
    y = _gelu(y)
    y = _bn_train(y, vec[4:5, :], vec[5:6, :])
    y3 = y.reshape(N, Lp, dim)
    hext_ref[:, Pa:Pa + Lp, :] = y3                        # feed next block

    # ---- last step: fused AdaptiveAvgPool1d(1) ----
    @pl.when(d == pl.num_programs(0) - 1)
    def _():
        out_ref[...] = jnp.mean(y3, axis=1)


# ----------------------------- forward wrapper ------------------------------

def _physical_vmem_bytes():
    try:
        info = pltpu.get_tpu_info()
        for name in ("vmem_capacity_bytes", "vmem_bytes", "vmem_size_bytes"):
            v = getattr(info, name, None)
            if v:
                return int(v)
    except Exception:
        pass
    return 64 * 1024 * 1024      # conservative fallback: v7x physical per-core VMEM


def classifier_encoder_forward(x, params, *, patch_size, kernel_size, out_dim=None):
    """x: (N, in_chans, L) float32, PyTorch NCL layout. Returns (N, dim, 1)."""
    N, Cin, L = x.shape
    Lp = L // patch_size
    dim = params["w_patch"].shape[1]            # lane-padded channel count
    depth = params["wd"].shape[0]
    K = kernel_size
    assert K % 2 == 1, "padding='same' with even kernel_size not implemented"
    P = (K - 1) // 2
    # head halo: multiple of 8 (>= conv reach) so sublane slice starts stay aligned
    Pa = max(8, _round_up(max(P, K - 1 - P), 8))
    # tail halo absorbs Lp misalignment so Lext % 8 == 0 and the flattened
    # reshapes in the tap loop are layout-preserving views
    Pt = Pa + (-Lp) % 8
    Lext = Pa + Lp + Pt
    assert Pa >= max(P, K - 1 - P) and Pt >= max(P, K - 1 - P)   # halo invariant
    assert Lext % 8 == 0 and dim % LANE == 0

    # patchify (kernel = stride = patch_size) == per-patch matmul; bf16 operand
    xp = (x.reshape(N, Cin, Lp, patch_size)
            .transpose(0, 2, 1, 3)
            .reshape(N * Lp, Cin * patch_size)).astype(jnp.bfloat16)

    kern = functools.partial(_encoder_kernel, N=N, Lp=Lp, dim=dim,
                             K=K, P=P, Pa=Pa, Pt=Pt)

    # generation-aware VMEM budget (review: don't hard-code the limit)
    f32b, bf16b = 4, 2
    est = (N * Lext * dim * f32b                         # persistent activation scratch
           + N * Lp * Cin * patch_size * bf16b           # xp staging (single buffer)
           + 2 * (Cin * patch_size * dim * bf16b         # double-buffered small inputs
                  + 8 * dim * f32b
                  + K * dim * f32b
                  + dim * dim * bf16b
                  + 8 * dim * f32b)
           + 2 * N * dim * f32b                          # output
           + 5 * N * Lext * dim * f32b)                  # compiler temporaries (acc, h, y, ...)
    vmem_limit = int(min(max(est + (4 << 20), 32 << 20),
                         int(0.75 * _physical_vmem_bytes())))

    grid_spec = pltpu.PrefetchScalarGridSpec(
        num_scalar_prefetch=0,
        grid=(depth,),
        in_specs=[
            pl.BlockSpec(memory_space=pl.ANY),                        # xp: manual DMA at d==0
            pl.BlockSpec((Cin * patch_size, dim), lambda d: (0, 0)),  # w_patch (bf16)
            pl.BlockSpec((8, dim), lambda d: (0, 0)),                 # patchify vectors
            pl.BlockSpec((1, K, dim), lambda d: (d, 0, 0)),           # depthwise taps
            pl.BlockSpec((1, dim, dim), lambda d: (d, 0, 0)),         # pointwise weight (bf16)
            pl.BlockSpec((1, 8, dim), lambda d: (d, 0, 0)),           # packed block vectors
        ],
        out_specs=pl.BlockSpec((N, dim), lambda d: (0, 0)),           # resident across depth
        scratch_shapes=[
            pltpu.VMEM((N, Lext, dim), jnp.float32),                  # persistent activation
            pltpu.VMEM((N * Lp, Cin * patch_size), jnp.bfloat16),     # xp staging buffer
            pltpu.SemaphoreType.DMA,                                  # xp DMA semaphore
        ],
    )

    pooled = pl.pallas_call(
        kern,
        out_shape=jax.ShapeDtypeStruct((N, dim), jnp.float32),
        grid_spec=grid_spec,
        compiler_params=pltpu.CompilerParams(
            dimension_semantics=("arbitrary",),        # depth loop is sequential
            vmem_limit_bytes=vmem_limit,
        ),
    )(xp, params["w_patch"], params["patch_vecs"],
      params["wd"], params["wp"], params["blk_vecs"])

    if out_dim is None:
        out_dim = dim
    return pooled[:, :out_dim, None]          # (N, dim, 1) — matches PyTorch output


# --------------------------- parameter init / packing -----------------------

def init_params(key, *, in_chans, dim, depth, kernel_size, patch_size):
    """Random parameters in PyTorch-native shapes (Conv1d / BatchNorm1d)."""
    def nrm(k, shape, scale=0.1):
        return scale * jax.random.normal(k, shape, jnp.float32)

    keys = iter(jax.random.split(key, 4 + depth * 8))
    params = {
        "w_patch": nrm(next(keys), (dim, in_chans, patch_size)),   # Conv1d (out,in,ps)
        "b_patch": nrm(next(keys), (dim,)),
        "g_patch": 1.0 + nrm(next(keys), (dim,)),                  # BN gamma
        "beta_patch": nrm(next(keys), (dim,)),                     # BN beta
        "blocks": [],
    }
    for _ in range(depth):
        params["blocks"].append({
            "w_dw": nrm(next(keys), (dim, 1, kernel_size)),  # depthwise (out, 1, K)
            "b_dw": nrm(next(keys), (dim,)),
            "g1": 1.0 + nrm(next(keys), (dim,)),
            "beta1": nrm(next(keys), (dim,)),
            "w_pw": nrm(next(keys), (dim, dim, 1)),          # pointwise (out, in, 1)
            "b_pw": nrm(next(keys), (dim,)),
            "g2": 1.0 + nrm(next(keys), (dim,)),
            "beta2": nrm(next(keys), (dim,)),
        })
    return params
    # TODO(synk): BatchNorm running_mean/running_var buffer updates (a training
    # side effect, not part of the returned activation) are not replicated.


def pack_params(tp, *, lane=LANE):
    """One-time repack: channels zero-padded to a lane multiple (lane-dense
    vregs / unmasked stores), matmul weights cast to bf16, per-block vectors
    packed into single (8, dim_p) tiles, blocks stacked along depth."""
    dim, in_chans, ps = tp["w_patch"].shape
    dim_p = _round_up(dim, lane)
    cpad = dim_p - dim

    def vpad(v):
        return jnp.pad(v, (0, cpad))            # padded channels: gamma=beta=bias=0

    zeros = jnp.zeros((dim_p,), jnp.float32)
    w_patch = jnp.pad(tp["w_patch"].reshape(dim, in_chans * ps).T,
                      ((0, 0), (0, cpad))).astype(jnp.bfloat16)       # (Cin*ps, dim_p)
    wd = jnp.stack([jnp.pad(b["w_dw"][:, 0, :].T, ((0, 0), (0, cpad)))
                    for b in tp["blocks"]])                            # (depth, K, dim_p) f32
    wp = jnp.stack([jnp.pad(b["w_pw"][:, :, 0].T, ((0, cpad), (0, cpad)))
                    for b in tp["blocks"]]).astype(jnp.bfloat16)       # (depth, dim_p, dim_p)
    return {
        "w_patch": w_patch,
        "patch_vecs": jnp.stack([vpad(tp["b_patch"]), vpad(tp["g_patch"]),
                                 vpad(tp["beta_patch"]),
                                 zeros, zeros, zeros, zeros, zeros]),  # (8, dim_p)
        "wd": wd,
        "wp": wp,
        "blk_vecs": jnp.stack([
            jnp.stack([vpad(b["b_dw"]), vpad(b["g1"]), vpad(b["beta1"]),
                       vpad(b["b_pw"]), vpad(b["g2"]), vpad(b["beta2"]),
                       zeros, zeros])
            for b in tp["blocks"]]),                                   # (depth, 8, dim_p)
    }


# --------------------------- pure-JAX reference (f32) -----------------------

def _reference_forward(x, tp, *, patch_size, kernel_size):
    N, Cin, L = x.shape
    Lp = L // patch_size
    dim = tp["w_patch"].shape[0]
    K, P = kernel_size, (kernel_size - 1) // 2

    def bn(y, g, b):
        m = jnp.mean(y, axis=0, keepdims=True)
        v = jnp.mean((y - m) ** 2, axis=0, keepdims=True)
        return g * (y - m) / jnp.sqrt(v + EPS) + b

    gelu = lambda v: jax.nn.gelu(v, approximate=False)

    xp = (x.reshape(N, Cin, Lp, patch_size).transpose(0, 2, 1, 3)
            .reshape(N * Lp, Cin * patch_size))
    y = gelu(xp @ tp["w_patch"].reshape(dim, -1).T + tp["b_patch"][None])
    h = bn(y, tp["g_patch"][None], tp["beta_patch"][None]).reshape(N, Lp, dim)

    for blk in tp["blocks"]:
        wd = blk["w_dw"][:, 0, :]                                  # (dim, K)
        hp = jnp.pad(h, ((0, 0), (P, K - 1 - P), (0, 0)))
        conv = sum(hp[:, k:k + Lp, :] * wd[:, k][None, None, :] for k in range(K))
        a = gelu(conv.reshape(-1, dim) + blk["b_dw"][None])
        a = bn(a, blk["g1"][None], blk["beta1"][None]) + h.reshape(-1, dim)
        y = gelu(a @ blk["w_pw"][:, :, 0].T + blk["b_pw"][None])
        y = bn(y, blk["g2"][None], blk["beta2"][None])
        h = y.reshape(N, Lp, dim)
    return jnp.mean(h, axis=1)[:, :, None]


# ----------------------------------- main -----------------------------------

if __name__ == "__main__":
    in_chans, dim, depth, kernel_size, patch_size, n_classes = 4, 32, 2, 9, 4, 10
    N, L = 2, 64                          # n_classes is unused by the forward pass

    key = jax.random.PRNGKey(0)
    kx, kp = jax.random.split(key)
    x = jax.random.normal(kx, (N, in_chans, L), jnp.float32)
    torch_params = init_params(kp, in_chans=in_chans, dim=dim, depth=depth,
                               kernel_size=kernel_size, patch_size=patch_size)
    params = pack_params(torch_params)

    fwd = jax.jit(functools.partial(classifier_encoder_forward,
                                    patch_size=patch_size,
                                    kernel_size=kernel_size,
                                    out_dim=dim))
    out = jax.block_until_ready(fwd(x, params))
    assert out.shape == (N, dim, 1) and out.dtype == jnp.float32

    # loose tolerance: bf16 MXU operands + A&S erf vs exact-erf f32 reference
    ref = _reference_forward(x, torch_params, patch_size=patch_size,
                             kernel_size=kernel_size)
    err = float(jnp.max(jnp.abs(out - ref)))
    assert err < 1e-1, f"kernel/reference mismatch: max |err| = {err}"
    print("KERNEL_OK")
</pallas_src>

<mosaic_0001>
module attributes {stable_mosaic.version = 11 : i64} {
  func.func @_encoder_kernel(%arg0: i32, %arg1: memref<32x16xbf16, #tpu.memory_space<any>>, %arg2: memref<16x128xbf16, #tpu.memory_space<vmem>>, %arg3: memref<8x128xf32, #tpu.memory_space<vmem>>, %arg4: memref<1x9x128xf32, #tpu.memory_space<vmem>>, %arg5: memref<1x128x128xbf16, #tpu.memory_space<vmem>>, %arg6: memref<1x8x128xf32, #tpu.memory_space<vmem>>, %arg7: memref<2x128xf32, #tpu.memory_space<vmem>>, %arg8: memref<2x32x128xf32, #tpu.memory_space<vmem>>, %arg9: memref<32x16xbf16, #tpu.memory_space<vmem>>, %arg10: memref<!tpu.dma_semaphore, #tpu.memory_space<semaphore_mem>>) attributes {dimension_semantics = [#tpu.dimension_semantics<arbitrary>], iteration_bounds = array<i64: 2>, scalar_prefetch = 0 : i64, scratch_operands = 3 : i64, tpu.core_type = #tpu.core_type<tc>, window_params = [{}, {pipeline_mode = #tpu.pipeline_mode<synchronous>, transform_indices = @transform_1, window_bounds = array<i64: 16, 128>}, {pipeline_mode = #tpu.pipeline_mode<synchronous>, transform_indices = @transform_2, window_bounds = array<i64: 8, 128>}, {transform_indices = @transform_3, window_bounds = array<i64: 1, 9, 128>}, {transform_indices = @transform_4, window_bounds = array<i64: 1, 128, 128>}, {transform_indices = @transform_5, window_bounds = array<i64: 1, 8, 128>}, {pipeline_mode = #tpu.pipeline_mode<synchronous>, transform_indices = @transform_6, window_bounds = array<i64: 2, 128>}]} {
    %c0_i32 = arith.constant 0 : i32
    %0 = arith.cmpi eq, %arg0, %c0_i32 : i32
    %1 = arith.extui %0 : i1 to i32
    %c0_i32_0 = arith.constant 0 : i32
    %2 = arith.cmpi ne, %1, %c0_i32_0 : i32
    scf.if %2 {
      %cst_58 = arith.constant 0.000000e+00 : f32
      %199 = vector.broadcast %cst_58 : f32 to vector<2x8x128xf32>
      %c0_59 = arith.constant 0 : index
      %c0_60 = arith.constant 0 : index
      %c0_61 = arith.constant 0 : index
      %200 = vector.load %arg8[%c0_59, %c0_60, %c0_61] : memref<2x32x128xf32, #tpu.memory_space<vmem>>, vector<2x8x128xf32>
      tpu.vector_store %arg8[%c0_59, %c0_60, %c0_61], %199 {strides = array<i32>} : memref<2x32x128xf32, #tpu.memory_space<vmem>>, vector<2x8x128xf32>,
      %cst_62 = arith.constant 0.000000e+00 : f32
      %201 = vector.broadcast %cst_62 : f32 to vector<2x8x128xf32>
      %c0_63 = arith.constant 0 : index
      %c24 = arith.constant 24 : index
      %c0_64 = arith.constant 0 : index
      %202 = vector.load %arg8[%c0_63, %c24, %c0_64] : memref<2x32x128xf32, #tpu.memory_space<vmem>>, vector<2x8x128xf32>
      tpu.vector_store %arg8[%c0_63, %c24, %c0_64], %201 {strides = array<i32>} : memref<2x32x128xf32, #tpu.memory_space<vmem>>, vector<2x8x128xf32>,
      tpu.enqueue_dma source(%arg1 : memref<32x16xbf16, #tpu.memory_space<any>>) target(%arg9 : memref<32x16xbf16, #tpu.memory_space<vmem>>) target_semaphore(%arg10 : memref<!tpu.dma_semaphore, #tpu.memory_space<semaphore_mem>>)
      tpu.wait_dma2 semaphore(%arg10 : memref<!tpu.dma_semaphore, #tpu.memory_space<semaphore_mem>>) src(%arg1 : memref<32x16xbf16, #tpu.memory_space<any>>) dst(%arg9 : memref<32x16xbf16, #tpu.memory_space<vmem>>)
      %c0_65 = arith.constant 0 : index
      %c0_66 = arith.constant 0 : index
      %203 = vector.load %arg9[%c0_65, %c0_66] : memref<32x16xbf16, #tpu.memory_space<vmem>>, vector<32x16xbf16>
      %c0_67 = arith.constant 0 : index
      %c0_68 = arith.constant 0 : index
      %204 = vector.load %arg2[%c0_67, %c0_68] : memref<16x128xbf16, #tpu.memory_space<vmem>>, vector<16x128xbf16>
      %cst_69 = arith.constant dense<0.000000e+00> : vector<32x128xf32>
      %205 = tpu.matmul %203, %204, %cst_69 {dimension_numbers = #tpu.dot_dimension_numbers<[1], [0], [0], [1], [0, 0, 1, 1], [], []>} : vector<32x16xbf16>, vector<16x128xbf16>, vector<32x128xf32> -> vector<32x128xf32>
      %c0_70 = arith.constant 0 : index
      %c0_71 = arith.constant 0 : index
      %206 = vector.load %arg3[%c0_70, %c0_71] : memref<8x128xf32, #tpu.memory_space<vmem>>, vector<1x128xf32>
      %207 = vector.broadcast %206 : vector<1x128xf32> to vector<32x128xf32>
      %208 = arith.addf %205, %207 : vector<32x128xf32>
      %cst_72 = arith.constant 5.000000e-01 : f32
      %209 = vector.broadcast %cst_72 : f32 to vector<32x128xf32>
      %210 = arith.mulf %209, %208 : vector<32x128xf32>
      %cst_73 = arith.constant 0.707106769 : f32
      %211 = vector.broadcast %cst_73 : f32 to vector<32x128xf32>
      %212 = arith.mulf %208, %211 : vector<32x128xf32>
      %cst_74 = arith.constant 0.000000e+00 : f32
      %213 = vector.broadcast %cst_74 : f32 to vector<32x128xf32>
      %214 = arith.cmpf oge, %212, %213 : vector<32x128xf32>
      %cst_75 = arith.constant 1.000000e+00 : f32
      %cst_76 = arith.constant -1.000000e+00 : f32
      %215 = vector.broadcast %cst_75 : f32 to vector<32x128xf32>
      %216 = vector.broadcast %cst_76 : f32 to vector<32x128xf32>
      %217 = arith.select %214, %215, %216 : vector<32x128xi1>, vector<32x128xf32>
      %218 = math.absf %212 : vector<32x128xf32>
      %cst_77 = arith.constant 0.327591091 : f32
      %219 = vector.broadcast %cst_77 : f32 to vector<32x128xf32>
      %220 = arith.mulf %219, %218 : vector<32x128xf32>
      %cst_78 = arith.constant 1.000000e+00 : f32
      %221 = vector.broadcast %cst_78 : f32 to vector<32x128xf32>
      %222 = arith.addf %221, %220 : vector<32x128xf32>
      %cst_79 = arith.constant 1.000000e+00 : f32
      %223 = vector.broadcast %cst_79 : f32 to vector<32x128xf32>
      %224 = arith.divf %223, %222 : vector<32x128xf32>
      %cst_80 = arith.constant 1.06140542 : f32
      %225 = vector.broadcast %cst_80 : f32 to vector<32x128xf32>
      %226 = arith.mulf %225, %224 : vector<32x128xf32>
      %cst_81 = arith.constant -1.45315206 : f32
      %227 = vector.broadcast %cst_81 : f32 to vector<32x128xf32>
      %228 = arith.addf %226, %227 : vector<32x128xf32>
      %229 = arith.mulf %228, %224 : vector<32x128xf32>
      %cst_82 = arith.constant 1.42141378 : f32
      %230 = vector.broadcast %cst_82 : f32 to vector<32x128xf32>
      %231 = arith.addf %229, %230 : vector<32x128xf32>
      %232 = arith.mulf %231, %224 : vector<32x128xf32>
      %cst_83 = arith.constant -0.284496725 : f32
      %233 = vector.broadcast %cst_83 : f32 to vector<32x128xf32>
      %234 = arith.addf %232, %233 : vector<32x128xf32>
      %235 = arith.mulf %234, %224 : vector<32x128xf32>
      %cst_84 = arith.constant 0.254829586 : f32
      %236 = vector.broadcast %cst_84 : f32 to vector<32x128xf32>
      %237 = arith.addf %235, %236 : vector<32x128xf32>
      %238 = arith.mulf %237, %224 : vector<32x128xf32>
      %cst_85 = arith.constant 0.000000e+00 : f32
      %239 = vector.broadcast %cst_85 : f32 to vector<32x128xf32>
      %240 = arith.subf %239, %218 : vector<32x128xf32>
      %241 = arith.mulf %240, %218 : vector<32x128xf32>
      %242 = math.exp %241 : vector<32x128xf32>
      %243 = arith.mulf %238, %242 : vector<32x128xf32>
      %cst_86 = arith.constant 1.000000e+00 : f32
      %244 = vector.broadcast %cst_86 : f32 to vector<32x128xf32>
      %245 = arith.subf %244, %243 : vector<32x128xf32>
      %246 = arith.mulf %217, %245 : vector<32x128xf32>
      %cst_87 = arith.constant 1.000000e+00 : f32
      %247 = vector.broadcast %cst_87 : f32 to vector<32x128xf32>
      %248 = arith.addf %247, %246 : vector<32x128xf32>
      %249 = arith.mulf %210, %248 : vector<32x128xf32>
      %c1 = arith.constant 1 : index
      %c0_88 = arith.constant 0 : index
      %250 = vector.load %arg3[%c1, %c0_88] : memref<8x128xf32, #tpu.memory_space<vmem>>, vector<1x128xf32>
      %c2 = arith.constant 2 : index
      %c0_89 = arith.constant 0 : index
      %251 = vector.load %arg3[%c2, %c0_89] : memref<8x128xf32, #tpu.memory_space<vmem>>, vector<1x128xf32>
      %cst_90 = arith.constant dense<0.000000e+00> : vector<128xf32>
      %252 = vector.multi_reduction <add>, %249, %cst_90 [0] : vector<32x128xf32> to vector<128xf32>
      %253 = vector.shape_cast %252 : vector<128xf32> to vector<1x128xf32>
      %cst_91 = arith.constant 3.200000e+01 : f32
      %254 = vector.broadcast %cst_91 : f32 to vector<1x128xf32>
      %255 = arith.divf %253, %254 : vector<1x128xf32>
      %256 = vector.broadcast %255 : vector<1x128xf32> to vector<32x128xf32>
      %257 = arith.subf %249, %256 : vector<32x128xf32>
      %258 = arith.mulf %257, %257 : vector<32x128xf32>
      %cst_92 = arith.constant dense<0.000000e+00> : vector<128xf32>
      %259 = vector.multi_reduction <add>, %258, %cst_92 [0] : vector<32x128xf32> to vector<128xf32>
      %260 = vector.shape_cast %259 : vector<128xf32> to vector<1x128xf32>
      %cst_93 = arith.constant 3.200000e+01 : f32
      %261 = vector.broadcast %cst_93 : f32 to vector<1x128xf32>
      %262 = arith.divf %260, %261 : vector<1x128xf32>
      %cst_94 = arith.constant 9.99999974E-6 : f32
      %263 = vector.broadcast %cst_94 : f32 to vector<1x128xf32>
      %264 = arith.addf %262, %263 : vector<1x128xf32>
      %265 = math.rsqrt %264 : vector<1x128xf32>
      %266 = vector.broadcast %265 : vector<1x128xf32> to vector<32x128xf32>
      %267 = arith.mulf %257, %266 : vector<32x128xf32>
      %268 = vector.broadcast %250 : vector<1x128xf32> to vector<32x128xf32>
      %269 = arith.mulf %268, %267 : vector<32x128xf32>
      %270 = vector.broadcast %251 : vector<1x128xf32> to vector<32x128xf32>
      %271 = arith.addf %269, %270 : vector<32x128xf32>
      %272 = vector.shape_cast %271 : vector<32x128xf32> to vector<2x16x128xf32>
      %c0_95 = arith.constant 0 : index
      %c8_96 = arith.constant 8 : index
      %c0_97 = arith.constant 0 : index
      %273 = vector.load %arg8[%c0_95, %c8_96, %c0_97] : memref<2x32x128xf32, #tpu.memory_space<vmem>>, vector<2x16x128xf32>
      tpu.vector_store %arg8[%c0_95, %c8_96, %c0_97], %272 {strides = array<i32>} : memref<2x32x128xf32, #tpu.memory_space<vmem>>, vector<2x16x128xf32>,
    } else {
    }
    %c0 = arith.constant 0 : index
    %c0_1 = arith.constant 0 : index
    %c0_2 = arith.constant 0 : index
    %3 = vector.load %arg8[%c0, %c0_1, %c0_2] : memref<2x32x128xf32, #tpu.memory_space<vmem>>, vector<2x32x128xf32>
    %4 = vector.shape_cast %3 : vector<2x32x128xf32> to vector<64x128xf32>
    %c0_3 = arith.constant 0 : index
    %c0_4 = arith.constant 0 : index
    %c0_5 = arith.constant 0 : index
    %5 = vector.load %arg4[%c0_3, %c0_4, %c0_5] : memref<1x9x128xf32, #tpu.memory_space<vmem>>, vector<1x9x128xf32>
    %6 = vector.shape_cast %5 : vector<1x9x128xf32> to vector<9x128xf32>
    %c0_6 = arith.constant 0 : index
    %c0_7 = arith.constant 0 : index
    %c0_8 = arith.constant 0 : index
    %7 = vector.load %arg6[%c0_6, %c0_7, %c0_8] : memref<1x8x128xf32, #tpu.memory_space<vmem>>, vector<1x8x128xf32>
    %8 = vector.shape_cast %7 : vector<1x8x128xf32> to vector<8x128xf32>
    %9 = vector.extract_strided_slice %6 {offsets = [4, 0], sizes = [1, 128], strides = [1, 1]} : vector<9x128xf32> to vector<1x128xf32>
    %10 = vector.broadcast %9 : vector<1x128xf32> to vector<64x128xf32>
    %11 = arith.mulf %4, %10 : vector<64x128xf32>
    %c4_i32 = arith.constant 4 : i32
    %12 = tpu.dynamic_rotate %4 by %c4_i32 dim 0 : vector<64x128xf32>, i32 -> vector<64x128xf32>
    %13 = vector.extract_strided_slice %6 {offsets = [0, 0], sizes = [1, 128], strides = [1, 1]} : vector<9x128xf32> to vector<1x128xf32>
    %14 = vector.broadcast %13 : vector<1x128xf32> to vector<64x128xf32>
    %15 = arith.mulf %12, %14 : vector<64x128xf32>
    %16 = arith.addf %11, %15 : vector<64x128xf32>
    %c3_i32 = arith.constant 3 : i32
    %17 = tpu.dynamic_rotate %4 by %c3_i32 dim 0 : vector<64x128xf32>, i32 -> vector<64x128xf32>
    %18 = vector.extract_strided_slice %6 {offsets = [1, 0], sizes = [1, 128], strides = [1, 1]} : vector<9x128xf32> to vector<1x128xf32>
    %19 = vector.broadcast %18 : vector<1x128xf32> to vector<64x128xf32>
    %20 = arith.mulf %17, %19 : vector<64x128xf32>
    %21 = arith.addf %16, %20 : vector<64x128xf32>
    %c2_i32 = arith.constant 2 : i32
    %22 = tpu.dynamic_rotate %4 by %c2_i32 dim 0 : vector<64x128xf32>, i32 -> vector<64x128xf32>
    %23 = vector.extract_strided_slice %6 {offsets = [2, 0], sizes = [1, 128], strides = [1, 1]} : vector<9x128xf32> to vector<1x128xf32>
    %24 = vector.broadcast %23 : vector<1x128xf32> to vector<64x128xf32>
    %25 = arith.mulf %22, %24 : vector<64x128xf32>
    %26 = arith.addf %21, %25 : vector<64x128xf32>
    %c1_i32 = arith.constant 1 : i32
    %27 = tpu.dynamic_rotate %4 by %c1_i32 dim 0 : vector<64x128xf32>, i32 -> vector<64x128xf32>
    %28 = vector.extract_strided_slice %6 {offsets = [3, 0], sizes = [1, 128], strides = [1, 1]} : vector<9x128xf32> to vector<1x128xf32>
    %29 = vector.broadcast %28 : vector<1x128xf32> to vector<64x128xf32>
    %30 = arith.mulf %27, %29 : vector<64x128xf32>
    %31 = arith.addf %26, %30 : vector<64x128xf32>
    %c63_i32 = arith.constant 63 : i32
    %32 = tpu.dynamic_rotate %4 by %c63_i32 dim 0 : vector<64x128xf32>, i32 -> vector<64x128xf32>
    %33 = vector.extract_strided_slice %6 {offsets = [5, 0], sizes = [1, 128], strides = [1, 1]} : vector<9x128xf32> to vector<1x128xf32>
    %34 = vector.broadcast %33 : vector<1x128xf32> to vector<64x128xf32>
    %35 = arith.mulf %32, %34 : vector<64x128xf32>
    %36 = arith.addf %31, %35 : vector<64x128xf32>
    %c62_i32 = arith.constant 62 : i32
    %37 = tpu.dynamic_rotate %4 by %c62_i32 dim 0 : vector<64x128xf32>, i32 -> vector<64x128xf32>
    %38 = vector.extract_strided_slice %6 {offsets = [6, 0], sizes = [1, 128], strides = [1, 1]} : vector<9x128xf32> to vector<1x128xf32>
    %39 = vector.broadcast %38 : vector<1x128xf32> to vector<64x128xf32>
    %40 = arith.mulf %37, %39 : vector<64x128xf32>
    %41 = arith.addf %36, %40 : vector<64x128xf32>
    %c61_i32 = arith.constant 61 : i32
    %42 = tpu.dynamic_rotate %4 by %c61_i32 dim 0 : vector<64x128xf32>, i32 -> vector<64x128xf32>
    %43 = vector.extract_strided_slice %6 {offsets = [7, 0], sizes = [1, 128], strides = [1, 1]} : vector<9x128xf32> to vector<1x128xf32>
    %44 = vector.broadcast %43 : vector<1x128xf32> to vector<64x128xf32>
    %45 = arith.mulf %42, %44 : vector<64x128xf32>
    %46 = arith.addf %41, %45 : vector<64x128xf32>
    %c60_i32 = arith.constant 60 : i32
    %47 = tpu.dynamic_rotate %4 by %c60_i32 dim 0 : vector<64x128xf32>, i32 -> vector<64x128xf32>
    %48 = vector.extract_strided_slice %6 {offsets = [8, 0], sizes = [1, 128], strides = [1, 1]} : vector<9x128xf32> to vector<1x128xf32>
    %49 = vector.broadcast %48 : vector<1x128xf32> to vector<64x128xf32>
    %50 = arith.mulf %47, %49 : vector<64x128xf32>
    %51 = arith.addf %46, %50 : vector<64x128xf32>
    %52 = vector.shape_cast %51 : vector<64x128xf32> to vector<2x32x128xf32>
    %53 = vector.extract_strided_slice %52 {offsets = [0, 8, 0], sizes = [2, 16, 128], strides = [1, 1, 1]} : vector<2x32x128xf32> to vector<2x16x128xf32>
    %54 = vector.shape_cast %53 : vector<2x16x128xf32> to vector<32x128xf32>
    %55 = vector.extract_strided_slice %3 {offsets = [0, 8, 0], sizes = [2, 16, 128], strides = [1, 1, 1]} : vector<2x32x128xf32> to vector<2x16x128xf32>
    %56 = vector.shape_cast %55 : vector<2x16x128xf32> to vector<32x128xf32>
    %57 = vector.extract_strided_slice %8 {offsets = [0, 0], sizes = [1, 128], strides = [1, 1]} : vector<8x128xf32> to vector<1x128xf32>
    %58 = vector.broadcast %57 : vector<1x128xf32> to vector<32x128xf32>
    %59 = arith.addf %54, %58 : vector<32x128xf32>
    %cst = arith.constant 5.000000e-01 : f32
    %60 = vector.broadcast %cst : f32 to vector<32x128xf32>
    %61 = arith.mulf %60, %59 : vector<32x128xf32>
    %cst_9 = arith.constant 0.707106769 : f32
    %62 = vector.broadcast %cst_9 : f32 to vector<32x128xf32>
    %63 = arith.mulf %59, %62 : vector<32x128xf32>
    %cst_10 = arith.constant 0.000000e+00 : f32
    %64 = vector.broadcast %cst_10 : f32 to vector<32x128xf32>
    %65 = arith.cmpf oge, %63, %64 : vector<32x128xf32>
    %cst_11 = arith.constant 1.000000e+00 : f32
    %cst_12 = arith.constant -1.000000e+00 : f32
    %66 = vector.broadcast %cst_11 : f32 to vector<32x128xf32>
    %67 = vector.broadcast %cst_12 : f32 to vector<32x128xf32>
    %68 = arith.select %65, %66, %67 : vector<32x128xi1>, vector<32x128xf32>
    %69 = math.absf %63 : vector<32x128xf32>
    %cst_13 = arith.constant 0.327591091 : f32
    %70 = vector.broadcast %cst_13 : f32 to vector<32x128xf32>
    %71 = arith.mulf %70, %69 : vector<32x128xf32>
    %cst_14 = arith.constant 1.000000e+00 : f32
    %72 = vector.broadcast %cst_14 : f32 to vector<32x128xf32>
    %73 = arith.addf %72, %71 : vector<32x128xf32>
    %cst_15 = arith.constant 1.000000e+00 : f32
    %74 = vector.broadcast %cst_15 : f32 to vector<32x128xf32>
    %75 = arith.divf %74, %73 : vector<32x128xf32>
    %cst_16 = arith.constant 1.06140542 : f32
    %76 = vector.broadcast %cst_16 : f32 to vector<32x128xf32>
    %77 = arith.mulf %76, %75 : vector<32x128xf32>
    %cst_17 = arith.constant -1.45315206 : f32
    %78 = vector.broadcast %cst_17 : f32 to vector<32x128xf32>
    %79 = arith.addf %77, %78 : vector<32x128xf32>
    %80 = arith.mulf %79, %75 : vector<32x128xf32>
    %cst_18 = arith.constant 1.42141378 : f32
    %81 = vector.broadcast %cst_18 : f32 to vector<32x128xf32>
    %82 = arith.addf %80, %81 : vector<32x128xf32>
    %83 = arith.mulf %82, %75 : vector<32x128xf32>
    %cst_19 = arith.constant -0.284496725 : f32
    %84 = vector.broadcast %cst_19 : f32 to vector<32x128xf32>
    %85 = arith.addf %83, %84 : vector<32x128xf32>
    %86 = arith.mulf %85, %75 : vector<32x128xf32>
    %cst_20 = arith.constant 0.254829586 : f32
    %87 = vector.broadcast %cst_20 : f32 to vector<32x128xf32>
    %88 = arith.addf %86, %87 : vector<32x128xf32>
    %89 = arith.mulf %88, %75 : vector<32x128xf32>
    %cst_21 = arith.constant 0.000000e+00 : f32
    %90 = vector.broadcast %cst_21 : f32 to vector<32x128xf32>
    %91 = arith.subf %90, %69 : vector<32x128xf32>
    %92 = arith.mulf %91, %69 : vector<32x128xf32>
    %93 = math.exp %92 : vector<32x128xf32>
    %94 = arith.mulf %89, %93 : vector<32x128xf32>
    %cst_22 = arith.constant 1.000000e+00 : f32
    %95 = vector.broadcast %cst_22 : f32 to vector<32x128xf32>
    %96 = arith.subf %95, %94 : vector<32x128xf32>
    %97 = arith.mulf %68, %96 : vector<32x128xf32>
    %cst_23 = arith.constant 1.000000e+00 : f32
    %98 = vector.broadcast %cst_23 : f32 to vector<32x128xf32>
    %99 = arith.addf %98, %97 : vector<32x128xf32>
    %100 = arith.mulf %61, %99 : vector<32x128xf32>
    %101 = vector.extract_strided_slice %8 {offsets = [1, 0], sizes = [1, 128], strides = [1, 1]} : vector<8x128xf32> to vector<1x128xf32>
    %102 = vector.extract_strided_slice %8 {offsets = [2, 0], sizes = [1, 128], strides = [1, 1]} : vector<8x128xf32> to vector<1x128xf32>
    %cst_24 = arith.constant dense<0.000000e+00> : vector<128xf32>
    %103 = vector.multi_reduction <add>, %100, %cst_24 [0] : vector<32x128xf32> to vector<128xf32>
    %104 = vector.shape_cast %103 : vector<128xf32> to vector<1x128xf32>
    %cst_25 = arith.constant 3.200000e+01 : f32
    %105 = vector.broadcast %cst_25 : f32 to vector<1x128xf32>
    %106 = arith.divf %104, %105 : vector<1x128xf32>
    %107 = vector.broadcast %106 : vector<1x128xf32> to vector<32x128xf32>
    %108 = arith.subf %100, %107 : vector<32x128xf32>
    %109 = arith.mulf %108, %108 : vector<32x128xf32>
    %cst_26 = arith.constant dense<0.000000e+00> : vector<128xf32>
    %110 = vector.multi_reduction <add>, %109, %cst_26 [0] : vector<32x128xf32> to vector<128xf32>
    %111 = vector.shape_cast %110 : vector<128xf32> to vector<1x128xf32>
    %cst_27 = arith.constant 3.200000e+01 : f32
    %112 = vector.broadcast %cst_27 : f32 to vector<1x128xf32>
    %113 = arith.divf %111, %112 : vector<1x128xf32>
    %cst_28 = arith.constant 9.99999974E-6 : f32
    %114 = vector.broadcast %cst_28 : f32 to vector<1x128xf32>
    %115 = arith.addf %113, %114 : vector<1x128xf32>
    %116 = math.rsqrt %115 : vector<1x128xf32>
    %117 = vector.broadcast %116 : vector<1x128xf32> to vector<32x128xf32>
    %118 = arith.mulf %108, %117 : vector<32x128xf32>
    %119 = vector.broadcast %101 : vector<1x128xf32> to vector<32x128xf32>
    %120 = arith.mulf %119, %118 : vector<32x128xf32>
    %121 = vector.broadcast %102 : vector<1x128xf32> to vector<32x128xf32>
    %122 = arith.addf %120, %121 : vector<32x128xf32>
    %123 = arith.addf %122, %56 : vector<32x128xf32>
    %124 = arith.truncf %123 : vector<32x128xf32> to vector<32x128xbf16>
    %c0_29 = arith.constant 0 : index
    %c0_30 = arith.constant 0 : index
    %c0_31 = arith.constant 0 : index
    %125 = vector.load %arg5[%c0_29, %c0_30, %c0_31] : memref<1x128x128xbf16, #tpu.memory_space<vmem>>, vector<1x128x128xbf16>
    %126 = vector.shape_cast %125 : vector<1x128x128xbf16> to vector<128x128xbf16>
    %cst_32 = arith.constant dense<0.000000e+00> : vector<32x128xf32>
    %127 = tpu.matmul %124, %126, %cst_32 {dimension_numbers = #tpu.dot_dimension_numbers<[1], [0], [0], [1], [0, 0, 1, 1], [], []>} : vector<32x128xbf16>, vector<128x128xbf16>, vector<32x128xf32> -> vector<32x128xf32>
    %128 = vector.extract_strided_slice %8 {offsets = [3, 0], sizes = [1, 128], strides = [1, 1]} : vector<8x128xf32> to vector<1x128xf32>
    %129 = vector.broadcast %128 : vector<1x128xf32> to vector<32x128xf32>
    %130 = arith.addf %127, %129 : vector<32x128xf32>
    %cst_33 = arith.constant 5.000000e-01 : f32
    %131 = vector.broadcast %cst_33 : f32 to vector<32x128xf32>
    %132 = arith.mulf %131, %130 : vector<32x128xf32>
    %cst_34 = arith.constant 0.707106769 : f32
    %133 = vector.broadcast %cst_34 : f32 to vector<32x128xf32>
    %134 = arith.mulf %130, %133 : vector<32x128xf32>
    %cst_35 = arith.constant 0.000000e+00 : f32
    %135 = vector.broadcast %cst_35 : f32 to vector<32x128xf32>
    %136 = arith.cmpf oge, %134, %135 : vector<32x128xf32>
    %cst_36 = arith.constant 1.000000e+00 : f32
    %cst_37 = arith.constant -1.000000e+00 : f32
    %137 = vector.broadcast %cst_36 : f32 to vector<32x128xf32>
    %138 = vector.broadcast %cst_37 : f32 to vector<32x128xf32>
    %139 = arith.select %136, %137, %138 : vector<32x128xi1>, vector<32x128xf32>
    %140 = math.absf %134 : vector<32x128xf32>
    %cst_38 = arith.constant 0.327591091 : f32
    %141 = vector.broadcast %cst_38 : f32 to vector<32x128xf32>
    %142 = arith.mulf %141, %140 : vector<32x128xf32>
    %cst_39 = arith.constant 1.000000e+00 : f32
    %143 = vector.broadcast %cst_39 : f32 to vector<32x128xf32>
    %144 = arith.addf %143, %142 : vector<32x128xf32>
    %cst_40 = arith.constant 1.000000e+00 : f32
    %145 = vector.broadcast %cst_40 : f32 to vector<32x128xf32>
    %146 = arith.divf %145, %144 : vector<32x128xf32>
    %cst_41 = arith.constant 1.06140542 : f32
    %147 = vector.broadcast %cst_41 : f32 to vector<32x128xf32>
    %148 = arith.mulf %147, %146 : vector<32x128xf32>
    %cst_42 = arith.constant -1.45315206 : f32
    %149 = vector.broadcast %cst_42 : f32 to vector<32x128xf32>
    %150 = arith.addf %148, %149 : vector<32x128xf32>
    %151 = arith.mulf %150, %146 : vector<32x128xf32>
    %cst_43 = arith.constant 1.42141378 : f32
    %152 = vector.broadcast %cst_43 : f32 to vector<32x128xf32>
    %153 = arith.addf %151, %152 : vector<32x128xf32>
    %154 = arith.mulf %153, %146 : vector<32x128xf32>
    %cst_44 = arith.constant -0.284496725 : f32
    %155 = vector.broadcast %cst_44 : f32 to vector<32x128xf32>
    %156 = arith.addf %154, %155 : vector<32x128xf32>
    %157 = arith.mulf %156, %146 : vector<32x128xf32>
    %cst_45 = arith.constant 0.254829586 : f32
    %158 = vector.broadcast %cst_45 : f32 to vector<32x128xf32>
    %159 = arith.addf %157, %158 : vector<32x128xf32>
    %160 = arith.mulf %159, %146 : vector<32x128xf32>
    %cst_46 = arith.constant 0.000000e+00 : f32
    %161 = vector.broadcast %cst_46 : f32 to vector<32x128xf32>
    %162 = arith.subf %161, %140 : vector<32x128xf32>
    %163 = arith.mulf %162, %140 : vector<32x128xf32>
    %164 = math.exp %163 : vector<32x128xf32>
    %165 = arith.mulf %160, %164 : vector<32x128xf32>
    %cst_47 = arith.constant 1.000000e+00 : f32
    %166 = vector.broadcast %cst_47 : f32 to vector<32x128xf32>
    %167 = arith.subf %166, %165 : vector<32x128xf32>
    %168 = arith.mulf %139, %167 : vector<32x128xf32>
    %cst_48 = arith.constant 1.000000e+00 : f32
    %169 = vector.broadcast %cst_48 : f32 to vector<32x128xf32>
    %170 = arith.addf %169, %168 : vector<32x128xf32>
    %171 = arith.mulf %132, %170 : vector<32x128xf32>
    %172 = vector.extract_strided_slice %8 {offsets = [4, 0], sizes = [1, 128], strides = [1, 1]} : vector<8x128xf32> to vector<1x128xf32>
    %173 = vector.extract_strided_slice %8 {offsets = [5, 0], sizes = [1, 128], strides = [1, 1]} : vector<8x128xf32> to vector<1x128xf32>
    %cst_49 = arith.constant dense<0.000000e+00> : vector<128xf32>
    %174 = vector.multi_reduction <add>, %171, %cst_49 [0] : vector<32x128xf32> to vector<128xf32>
    %175 = vector.shape_cast %174 : vector<128xf32> to vector<1x128xf32>
    %cst_50 = arith.constant 3.200000e+01 : f32
    %176 = vector.broadcast %cst_50 : f32 to vector<1x128xf32>
    %177 = arith.divf %175, %176 : vector<1x128xf32>
    %178 = vector.broadcast %177 : vector<1x128xf32> to vector<32x128xf32>
    %179 = arith.subf %171, %178 : vector<32x128xf32>
    %180 = arith.mulf %179, %179 : vector<32x128xf32>
    %cst_51 = arith.constant dense<0.000000e+00> : vector<128xf32>
    %181 = vector.multi_reduction <add>, %180, %cst_51 [0] : vector<32x128xf32> to vector<128xf32>
    %182 = vector.shape_cast %181 : vector<128xf32> to vector<1x128xf32>
    %cst_52 = arith.constant 3.200000e+01 : f32
    %183 = vector.broadcast %cst_52 : f32 to vector<1x128xf32>
    %184 = arith.divf %182, %183 : vector<1x128xf32>
    %cst_53 = arith.constant 9.99999974E-6 : f32
    %185 = vector.broadcast %cst_53 : f32 to vector<1x128xf32>
    %186 = arith.addf %184, %185 : vector<1x128xf32>
    %187 = math.rsqrt %186 : vector<1x128xf32>
    %188 = vector.broadcast %187 : vector<1x128xf32> to vector<32x128xf32>
    %189 = arith.mulf %179, %188 : vector<32x128xf32>
    %190 = vector.broadcast %172 : vector<1x128xf32> to vector<32x128xf32>
    %191 = arith.mulf %190, %189 : vector<32x128xf32>
    %192 = vector.broadcast %173 : vector<1x128xf32> to vector<32x128xf32>
    %193 = arith.addf %191, %192 : vector<32x128xf32>
    %194 = vector.shape_cast %193 : vector<32x128xf32> to vector<2x16x128xf32>
    %c0_54 = arith.constant 0 : index
    %c8 = arith.constant 8 : index
    %c0_55 = arith.constant 0 : index
    %195 = vector.load %arg8[%c0_54, %c8, %c0_55] : memref<2x32x128xf32, #tpu.memory_space<vmem>>, vector<2x16x128xf32>
    tpu.vector_store %arg8[%c0_54, %c8, %c0_55], %194 {strides = array<i32>} : memref<2x32x128xf32, #tpu.memory_space<vmem>>, vector<2x16x128xf32>,
    %c1_i32_56 = arith.constant 1 : i32
    %196 = arith.cmpi eq, %arg0, %c1_i32_56 : i32
    %197 = arith.extui %196 : i1 to i32
    %c0_i32_57 = arith.constant 0 : i32
    %198 = arith.cmpi ne, %197, %c0_i32_57 : i32
    scf.if %198 {
      %cst_58 = arith.constant dense<0.000000e+00> : vector<2x128xf32>
      %199 = vector.multi_reduction <add>, %194, %cst_58 [1] : vector<2x16x128xf32> to vector<2x128xf32>
      %cst_59 = arith.constant 1.600000e+01 : f32
      %200 = vector.broadcast %cst_59 : f32 to vector<2x128xf32>
      %201 = arith.divf %199, %200 : vector<2x128xf32>
      %c0_60 = arith.constant 0 : index
      %c0_61 = arith.constant 0 : index
      %202 = vector.load %arg7[%c0_60, %c0_61] : memref<2x128xf32, #tpu.memory_space<vmem>>, vector<2x128xf32>
      tpu.vector_store %arg7[%c0_60, %c0_61], %201 {strides = array<i32>} : memref<2x128xf32, #tpu.memory_space<vmem>>, vector<2x128xf32>,
    } else {
    }
    return
  }
  func.func @transform_1(%arg0: i32) -> (i32, i32) {
    %c0_i32 = arith.constant 0 : i32
    %c0_i32_0 = arith.constant 0 : i32
    %c0_i32_1 = arith.constant 0 : i32
    return %c0_i32, %c0_i32_0 : i32, i32
  }
  func.func @transform_2(%arg0: i32) -> (i32, i32) {
    %c0_i32 = arith.constant 0 : i32
    %c0_i32_0 = arith.constant 0 : i32
    %c0_i32_1 = arith.constant 0 : i32
    return %c0_i32, %c0_i32_0 : i32, i32
  }
  func.func @transform_3(%arg0: i32) -> (i32, i32, i32) {
    %c0_i32 = arith.constant 0 : i32
    %c0_i32_0 = arith.constant 0 : i32
    %c0_i32_1 = arith.constant 0 : i32
    return %arg0, %c0_i32, %c0_i32_0 : i32, i32, i32
  }
  func.func @transform_4(%arg0: i32) -> (i32, i32, i32) {
    %c0_i32 = arith.constant 0 : i32
    %c0_i32_0 = arith.constant 0 : i32
    %c0_i32_1 = arith.constant 0 : i32
    return %arg0, %c0_i32, %c0_i32_0 : i32, i32, i32
  }
  func.func @transform_5(%arg0: i32) -> (i32, i32, i32) {
    %c0_i32 = arith.constant 0 : i32
    %c0_i32_0 = arith.constant 0 : i32
    %c0_i32_1 = arith.constant 0 : i32
    return %arg0, %c0_i32, %c0_i32_0 : i32, i32, i32
  }
  func.func @transform_6(%arg0: i32) -> (i32, i32) {
    %c0_i32 = arith.constant 0 : i32
    %c0_i32_0 = arith.constant 0 : i32
    %c0_i32_1 = arith.constant 0 : i32
    return %c0_i32, %c0_i32_0 : i32, i32
  }
}

</mosaic_0001>

<bundles_post_ra>
// kernel: classifier_encoder_forward.1
= control target key start
LH: loop header
LB: loop body
LE: loop exit
PB: predicated region body
PF: predicated region fallthrough
CT: control target
= control target key end

     0   :  { %11 = vsyncpa [#allocation6], 0  ;;  %s1629_s21 = smov 0   ;;  %s2047_s0 = inlined_call_operand.vmem [shape: bf16[32,16], index: 0, kind: input, shape index: {}]   ;;  %s2048_s1 = inlined_call_operand.vmem [shape: bf16[16,128], index: 1, kind: input, shape index: {}]   ;;  %s2049_s2 = inlined_call_operand.vmem [shape: f32[8,128], index: 2, kind: input, shape index: {}]   ;;  %s2050_s3 = inlined_call_operand.vmem [shape: f32[2,9,128], index: 3, kind: input, shape index: {}]   ;;  %s2051_s4 = inlined_call_operand.vmem [shape: bf16[2,128,128], index: 4, kind: input, shape index: {}]   ;;  %s2052_s5 = inlined_call_operand.vmem [shape: f32[2,8,128], index: 5, kind: input, shape index: {}]   ;;  %s2053_s6 = inlined_call_operand.hbm [shape: f32[2,128], index: 6, kind: output, shape index: {}]  }
   0x1 LB: > { %s1635_s22 = sadd.s32 4294967295, %s1585_s21   ;;  %p1379_p0 = scmp.ge.s32.totalorder %s1585_s21, 1  ;;  %s1585_s21 = sphi %s1629_s21, %s17_s21  }
   0x2   : > { %p203_p1 = scmp.lt.s32.totalorder %s1585_s21, 3 }
   0x4   : > { %p204_p2 = pnand %p1379_p0, %p203_p1 }
   0x5   : > { %p235_p3 = scmp.lt.s32.totalorder (!%p204_p2), %s1635_s22, 1  ;;  %p1385_p4 = scmp.ne.s32.totalorder (!%p204_p2), %s1635_s22, 0 }
   0x6   : > { %207 = sbr.rel (%p204_p2) target bundleno = 755 (0x2f3), region = 40 }
   0xb   : > { %s236_s23 = scalar_select %p235_p3, %s1635_s22, 1 }
   0xc   : > { %253 = sbr.rel (%p1385_p4) target bundleno = 293 (0x125), region = 44 }
   0xd   : > { %s1438_s24 = sshll.u32 %s236_s23, 4  ;;  %s1439_s25 = sshll.u32 %s236_s23, 6 }
   0xe   : > { %s1644_s28 = scalar_lea.vmem %s2050_s3, %s1438_s24  ;;  %s1649_s7 = scalar_lea.vmem %s2051_s4, %s1439_s25 }
   0xf   : > { %s1384_s8 = sshll.u32 %s236_s23, 3 }
  0x10   : > { %s1654_s11 = scalar_lea.vmem %s2052_s5, %s1384_s8 }
  0x11   : > { %v1587_v0 = vmov 0.0   ;;  %v268_v1 = vld [vmem:[%s2047_s0] sm:$0xff]  ;;  %v270_v2 = vld [vmem:[%s2047_s0 + $0x8] sm:$0xff] }
  0x12   : > { %254 = vst [vmem:[#allocation2 + $0x28] sm:$0xff] %v1587_v0 }
  0x13   : > { %255 = vst [vmem:[#allocation2] sm:$0xff] %v1587_v0 }
  0x14   : > { %256 = vst [vmem:[#allocation2 + $0x38] sm:$0xff] %v1587_v0 }
  0x15   : > { %257 = vst [vmem:[#allocation2 + $0x18] sm:$0xff] %v1587_v0 }
  0x16   : > { %269 = vst [vmem:[#allocation3] sm:$0xff] %v268_v1 }
  0x17   : > { %271 = vst [vmem:[#allocation3 + $0x8] sm:$0xff] %v270_v2 }
  0x18   : > { %277 = vsyncadd [#allocation4], 256 }
  0x19   : > { %1577 = dma.done.wait [#allocation4], 256 }
  0x1a   : > { %1578 = vsyncadd [#allocation4], 4294967040  ;;  %v1442_v3 = vld [vmem:[%s2048_s1] sm:$0xff]  ;;  %vm306_vm0 = vcmask 130048  }
  0x1b   : > { %320 = vmatpush.bf16.msra.mxu0 %v1442_v3  ;;  %1451 = vmatpush.bf16.msra.mxu1 %v1442_v3  ;;  %v1481_v6 = vld [vmem:[%s2049_s2] ss:$0 sm:$0xff] }
  0x1d   : > { %v1440_v4 = vld [vmem:[#allocation3] sm:$0xff] }
  0x1e   : > { %v1441_v5 = vld [vmem:[#allocation3 + $0x8] sm:$0xff]  ;;  %1398 = vmatmul.msk.bf16.vlgmr.msra.gmra.mxu0 %vm306_vm0, %v1440_v4 }
  0x1f   : > { %1399 = vmatmul.msk.bf16.vlgmr.msra.gmra.mxu1 %vm306_vm0, %v1441_v5 }
  0x9b   : > { %v322_v7 = vpop.f32.mrf.mxu0 }
  0x9c   : > { %v327_v8 = vpop.f32.mrf.mxu1  ;;  %v1669_v9 = vadd.f32 %v1481_v6, %v322_v7 }
  0x9d   : > { %v1671_v10 = vadd.f32 %v1481_v6, %v327_v8 }
  0x9e   : > { %v1674_v11 = vmul.f32 0.70710677, %v1669_v9 }
  0x9f   : > { %v1677_v12 = vmul.f32 0.70710677, %v1671_v10 }
  0xa0   : > { %v348_v13 = vand.u32 2147483647, %v1674_v11 }
  0xa1   : > { %v350_v14 = vand.u32 2147483647, %v1677_v12 }
  0xa2   : > { %v352_v15 = vmul.f32 0.3275911, %v348_v13  ;;  %v456_v34 = vsub.f32 0.0, %v348_v13 }
  0xa3   : > { %v354_v16 = vmul.f32 0.3275911, %v350_v14  ;;  %v324_v17 = vpop.f32.mrf.mxu0  ;;  %v458_v49 = vsub.f32 0.0, %v350_v14 }
  0xa4   : > { %v329_v18 = vpop.f32.mrf.mxu1  ;;  %v356_v19 = vadd.f32 1.0, %v352_v15  ;;  %v1681_v21 = vadd.f32 %v1481_v6, %v324_v17  ;;  %v460_v51 = vmul.f32 %v456_v34, %v348_v13 }
  0xa5   : > { %v358_v20 = vadd.f32 1.0, %v354_v16  ;;  %v1683_v22 = vadd.f32 %v1481_v6, %v329_v18  ;;  %v462_v63 = vmul.f32 %v458_v49, %v350_v14 }
  0xa6   : > { %1484 = vrcp.f32 %v356_v19  ;;  %v1686_v23 = vmul.f32 0.70710677, %v1681_v21  ;;  %v369_v36 = vand.u32 2147483647, %v356_v19  ;;  %v371_v37 = vand.u32 2147483648, %v356_v19 }
  0xa7   : > { %1486 = vrcp.f32 %v358_v20  ;;  %v1689_v24 = vmul.f32 0.70710677, %v1683_v22  ;;  %v401_v41 = vand.u32 2147483648, %v358_v20  ;;  %v399_v43 = vand.u32 2147483647, %v358_v20 }
  0xa8   : > { %v1692_v25 = vand.u32 2147483647, %v1686_v23  ;;  %vm365_vm3 = vweird.f32 %v356_v19  ;;  %v372_v45 = vor.u32 1.1754944e-38, %v371_v37  ;;  %vm395_vm5 = vweird.f32 %v358_v20 }
  0xa9   : > { %v1695_v27 = vand.u32 2147483647, %v1689_v24  ;;  %vm370_vm6 = vcmp.eq.f32.partialorder %v369_v36, 8.507059e+37  ;;  %v402_v48 = vor.u32 1.1754944e-38, %v401_v41  ;;  %vm400_vm8 = vcmp.eq.f32.partialorder %v399_v43, 8.507059e+37 }
  0xaa   : > { %v353_v30 = vmul.f32 0.3275911, %v1692_v25  ;;  %v464_v61 = vmul.f32 1.442695, %v460_v51  ;;  %v457_v17 = vsub.f32 0.0, %v1692_v25 }
  0xab   : > { %v355_v32 = vmul.f32 0.3275911, %v1695_v27  ;;  %v459_v36 = vsub.f32 0.0, %v1695_v27 }
  0xac   : > { %v1485_v26 = vpop.eup %1484  ;;  %v1699_v35 = vadd.f32 1.0, %v353_v30  ;;  %v461_v43 = vmul.f32 %v457_v17, %v1692_v25 }
  0xad   : > { %v1487_v28 = vpop.eup %1486  ;;  %v361_v29 = vmul.f32 %v1485_v26, %v356_v19  ;;  %v1701_v39 = vadd.f32 1.0, %v355_v32  ;;  %vm366_vm1 = vweird.f32 %v1485_v26 }
  0xae   : > { %v391_v31 = vmul.f32 %v1487_v28, %v358_v20  ;;  %1488 = vrcp.f32 %v1699_v35  ;;  %vm396_vm2 = vweird.f32 %v1487_v28  ;;  %vm367_vm4 = vmor %vm365_vm3, %vm366_vm1  ;;  %v384_v2 = vand.u32 2147483647, %v1699_v35 }
  0xaf   : > { %v362_v33 = vsub.f32 1.0, %v361_v29  ;;  %1490 = vrcp.f32 %v1701_v39  ;;  %vm397_vm7 = vmor %vm395_vm5, %vm396_vm2  ;;  %v386_v3 = vand.u32 2147483648, %v1699_v35  ;;  %v416_v7 = vand.u32 2147483648, %v1701_v39 }
  0xb0   : > { %v392_v38 = vsub.f32 1.0, %v391_v31  ;;  %v414_v15 = vand.u32 2147483647, %v1701_v39  ;;  %vm380_vm11 = vweird.f32 %v1699_v35  ;;  %vm410_vm13 = vweird.f32 %v1701_v39 }
  0xb1   : > { %v363_v40 = vmul.f32 %v1485_v26, %v362_v33  ;;  %v387_v19 = vor.u32 1.1754944e-38, %v386_v3  ;;  %vm385_vm14 = vcmp.eq.f32.partialorder %v384_v2, 8.507059e+37  ;;  %v417_v29 = vor.u32 1.1754944e-38, %v416_v7 }
  0xb2   : > { %v393_v42 = vmul.f32 %v1487_v28, %v392_v38  ;;  %vm415_vm0 = vcmp.eq.f32.partialorder %v414_v15, 8.507059e+37  ;;  %v468_v38 = vmul.f32 1.442695, %v462_v63  ;;  %1492 = vpow2.f32 %v464_v61 }
  0xb3   : > { %v364_v44 = vadd.f32 %v1485_v26, %v363_v40  ;;  %vm340_vm1 = vcmp.ge.f32.partialorder %v1674_v11, 0.0  ;;  %vm342_vm2 = vcmp.ge.f32.partialorder %v1677_v12, 0.0  ;;  %vm341_vm3 = vcmp.ge.f32.partialorder %v1686_v23, 0.0 }
  0xb4   : > { %v394_v46 = vadd.f32 %v1487_v28, %v393_v42  ;;  %v1489_v53 = vpop.eup %1488  ;;  %1494 = vpow2.f32 %v468_v38  ;;  %v333_v23 = vmul.f32 0.5, %v1681_v21 }
  0xb5   : > { %v368_v47 = vsel %vm367_vm4, %v1485_v26, %v364_v44  ;;  %v1491_v56 = vpop.eup %1490  ;;  %v376_v58 = vmul.f32 %v1489_v53, %v1699_v35  ;;  %vm381_vm9 = vweird.f32 %v1489_v53  ;;  %vm343_vm4 = vcmp.ge.f32.partialorder %v1689_v24, 0.0 }
  0xb6   : > { %v1705_v50 = vsel %vm370_vm6, %v372_v45, %v368_v47  ;;  %v398_v52 = vsel %vm397_vm7, %v1487_v28, %v394_v46  ;;  %v406_v60 = vmul.f32 %v1491_v56, %v1701_v39  ;;  %vm411_vm10 = vweird.f32 %v1491_v56  ;;  %vm382_vm12 = vmor %vm380_vm11, %vm381_vm9 }
  0xb7   : > { %v420_v54 = vmul.f32 1.0614054, %v1705_v50  ;;  %v403_v55 = vsel %vm400_vm8, %v402_v48, %v398_v52  ;;  %v377_v0 = vsub.f32 1.0, %v376_v58  ;;  %vm412_vm15 = vmor %vm410_vm13, %vm411_vm10  ;;  %v463_v47 = vmul.f32 %v459_v36, %v1695_v27 }
  0xb8   : > { %v422_v57 = vmul.f32 1.0614054, %v403_v55  ;;  %v407_v4 = vsub.f32 1.0, %v406_v60  ;;  %v466_v52 = vmul.f32 1.442695, %v461_v43  ;;  %v1493_v58 = vpop.eup %1492 }
  0xb9   : > { %v424_v59 = vadd.f32 -1.4531521, %v420_v54  ;;  %v378_v6 = vmul.f32 %v1489_v53, %v377_v0 }
  0xba   : > { %v426_v62 = vadd.f32 -1.4531521, %v422_v57  ;;  %v408_v13 = vmul.f32 %v1491_v56, %v407_v4  ;;  %v470_v57 = vmul.f32 1.442695, %v463_v47  ;;  %v1495_v25 = vpop.eup %1494  ;;  %1496 = vpow2.f32 %v466_v52 }
  0xbb   : > { %v428_v1 = vmul.f32 %v424_v59, %v1705_v50  ;;  %v379_v14 = vadd.f32 %v1489_v53, %v378_v6 }
  0xbc   : > { %v430_v5 = vmul.f32 %v426_v62, %v403_v55  ;;  %v409_v20 = vadd.f32 %v1491_v56, %v408_v13  ;;  %1498 = vpow2.f32 %v470_v57 }
  0xbd   : > { %v432_v8 = vadd.f32 1.4214138, %v428_v1  ;;  %v383_v28 = vsel %vm382_vm12, %v1489_v53, %v379_v14 }
  0xbe   : > { %v434_v16 = vadd.f32 1.4214138, %v430_v5  ;;  %v388_v31 = vsel %vm385_vm14, %v387_v19, %v383_v28  ;;  %v413_v32 = vsel %vm412_vm15, %v1491_v56, %v409_v20  ;;  %v1588_v5 = vmov -1.0  }
  0xbf   : > { %v436_v18 = vmul.f32 %v432_v8, %v1705_v50  ;;  %v421_v34 = vmul.f32 1.0614054, %v388_v31  ;;  %v418_v35 = vsel %vm415_vm0, %v417_v29, %v413_v32  ;;  %v344_v6 = vsel %vm340_vm1, 1.0, %v1588_v5 }
  0xc0   : > { %v438_v26 = vmul.f32 %v434_v16, %v403_v55  ;;  %v423_v40 = vmul.f32 1.0614054, %v418_v35  ;;  %v1497_v4 = vpop.eup %1496  ;;  %v1589_v16 = vmov 32.0   ;;  %v346_v14 = vsel %vm342_vm2, 1.0, %v1588_v5 }
  0xc1   : > { %v440_v30 = vadd.f32 -0.28449672, %v436_v18  ;;  %v425_v39 = vadd.f32 -1.4531521, %v421_v34  ;;  %1500 = vrcp.f32 %v1589_v16  ;;  %v345_v12 = vsel %vm341_vm3, 1.0, %v1588_v5 }
  0xc2   : > { %v442_v33 = vadd.f32 -0.28449672, %v438_v26  ;;  %v427_v44 = vadd.f32 -1.4531521, %v423_v40  ;;  %v1499_v8 = vpop.eup %1498  ;;  %v347_v28 = vsel %vm343_vm4, 1.0, %v1588_v5 }
  0xc3   : > { %v444_v37 = vmul.f32 %v440_v30, %v1705_v50  ;;  %v429_v46 = vmul.f32 %v425_v39, %v388_v31 }
  0xc4   : > { %v446_v41 = vmul.f32 %v442_v33, %v403_v55  ;;  %v431_v48 = vmul.f32 %v427_v44, %v418_v35 }
  0xc5   : > { %v448_v42 = vadd.f32 0.2548296, %v444_v37  ;;  %v433_v51 = vadd.f32 1.4214138, %v429_v46 }
  0xc6   : > { %v450_v45 = vadd.f32 0.2548296, %v446_v41  ;;  %v435_v53 = vadd.f32 1.4214138, %v431_v48  ;;  %v335_v41 = vmul.f32 0.5, %v1683_v22 }
  0xc7   : > { %v452_v49 = vmul.f32 %v448_v42, %v1705_v50  ;;  %v437_v56 = vmul.f32 %v433_v51, %v388_v31  ;;  %v1501_v30 = vpop.eup %1500 }
  0xc8   : > { %v454_v54 = vmul.f32 %v450_v45, %v403_v55  ;;  %v439_v59 = vmul.f32 %v435_v53, %v418_v35  ;;  %v504_v37 = vmul.f32 32.0, %v1501_v30  ;;  %vm508_vm5 = vweird.f32 %v1501_v30 }
  0xc9   : > { %v472_v60 = vmul.f32 %v1493_v58, %v452_v49  ;;  %v441_v61 = vadd.f32 -0.28449672, %v437_v56 }
  0xca   : > { %v443_v62 = vadd.f32 -0.28449672, %v439_v59  ;;  %v474_v63 = vmul.f32 %v1495_v25, %v454_v54  ;;  %v505_v43 = vsub.f32 1.0, %v504_v37 }
  0xcb   : > { %v445_v0 = vmul.f32 %v441_v61, %v388_v31  ;;  %v476_v50 = vsub.f32 1.0, %v472_v60 }
  0xcc   : > { %v447_v27 = vmul.f32 %v443_v62, %v418_v35  ;;  %v478_v55 = vsub.f32 1.0, %v474_v63 }
  0xcd   : > { %v449_v1 = vadd.f32 0.2548296, %v445_v0  ;;  %v480_v13 = vmul.f32 %v476_v50, %v344_v6 }
  0xce   : > { %v451_v2 = vadd.f32 0.2548296, %v447_v27  ;;  %v482_v17 = vmul.f32 %v478_v55, %v346_v14 }
  0xcf   : > { %v453_v3 = vmul.f32 %v449_v1, %v388_v31  ;;  %v484_v20 = vadd.f32 1.0, %v480_v13  ;;  %v332_v31 = vmul.f32 0.5, %v1669_v9  ;;  %v506_v9 = vmul.f32 %v1501_v30, %v505_v43 }
  0xd0   : > { %v455_v7 = vmul.f32 %v451_v2, %v418_v35  ;;  %v486_v32 = vadd.f32 1.0, %v482_v17  ;;  %v334_v35 = vmul.f32 0.5, %v1671_v10 }
  0xd1   : > { %v473_v15 = vmul.f32 %v1497_v4, %v453_v3  ;;  %v488_v34 = vmul.f32 %v484_v20, %v332_v31  ;;  %v507_v21 = vadd.f32 %v1501_v30, %v506_v9 }
  0xd2   : > { %v475_v11 = vmul.f32 %v1499_v8, %v455_v7  ;;  %v490_v38 = vmul.f32 %v486_v32, %v334_v35 }
  0xd3   : > { %v477_v18 = vsub.f32 1.0, %v473_v15  ;;  %v509_v10 = vsel %vm508_vm5, %v1501_v30, %v507_v21  ;;  %v1482_v15 = vld [vmem:[%s2049_s2 + $0x1] ss:$0 sm:$0xff] }
  0xd4   : > { %v479_v19 = vsub.f32 1.0, %v475_v11 }
  0xd5   : > { %v481_v26 = vmul.f32 %v477_v18, %v345_v12  ;;  %v1483_v12 = vld [vmem:[%s2049_s2 + $0x2] ss:$0 sm:$0xff] }
  0xd6   : > { %v483_v29 = vmul.f32 %v479_v19, %v347_v28 }
  0xd7   : > { %v485_v33 = vadd.f32 1.0, %v481_v26 }
  0xd8   : > { %v487_v36 = vadd.f32 1.0, %v483_v29 }
  0xd9   : > { %v489_v24 = vmul.f32 %v485_v33, %v333_v23 }
  0xda   : > { %v491_v39 = vmul.f32 %v487_v36, %v335_v41 }
  0xdb   : > { %v494_v40 = vadd.f32 %v489_v24, %v488_v34 }
  0xdd   : > { %v495_v42 = vadd.f32 %v494_v40, %v490_v38 }
  0xdf   : > { %v496_v44 = vadd.f32 %v495_v42, %v491_v39 }
  0xe1   : > { %v497_v45 = vrot.slane %v496_v44, 4 }
  0xe3   : > { %v498_v46 = vadd.f32 %v497_v45, %v496_v44 }
  0xe5   : > { %v499_v47 = vrot.slane %v498_v46, 2 }
  0xe7   : > { %v500_v48 = vadd.f32 %v499_v47, %v498_v46 }
  0xe9   : > { %v501_v49 = vrot.slane %v500_v48, 1 }
  0xeb   : > { %v502_v51 = vadd.f32 %v501_v49, %v500_v48 }
  0xed   : > { %v510_v52 = vmul.f32 %v509_v10, %v502_v51 }
  0xef   : > { %v511_v53 = vsub.f32 %v488_v34, %v510_v52  ;;  %v512_v54 = vsub.f32 %v489_v24, %v510_v52  ;;  %v513_v56 = vsub.f32 %v490_v38, %v510_v52  ;;  %v514_v57 = vsub.f32 %v491_v39, %v510_v52 }
  0xf1   : > { %v515_v22 = vmul.f32 %v511_v53, %v511_v53  ;;  %v516_v58 = vmul.f32 %v512_v54, %v512_v54  ;;  %v517_v59 = vmul.f32 %v513_v56, %v513_v56  ;;  %v518_v61 = vmul.f32 %v514_v57, %v514_v57 }
  0xf3   : > { %v519_v60 = vadd.f32 %v516_v58, %v515_v22 }
  0xf5   : > { %v520_v25 = vadd.f32 %v519_v60, %v517_v59 }
  0xf7   : > { %v521_v62 = vadd.f32 %v520_v25, %v518_v61 }
  0xf9   : > { %v522_v63 = vrot.slane %v521_v62, 4 }
  0xfb   : > { %v523_v0 = vadd.f32 %v522_v63, %v521_v62 }
  0xfd   : > { %v524_v27 = vrot.slane %v523_v0, 2 }
  0xff   : > { %v525_v50 = vadd.f32 %v524_v27, %v523_v0 }
 0x101   : > { %v526_v1 = vrot.slane %v525_v50, 1 }
 0x103   : > { %v527_v2 = vadd.f32 %v526_v1, %v525_v50 }
 0x105   : > { %v528_v55 = vmul.f32 %v527_v2, %v509_v10 }
 0x107   : > { %v529_v3 = vadd.f32 1e-05, %v528_v55 }
 0x109   : > { %1502 = vrsqrt.f32 %v529_v3  ;;  %vm536_vm7 = vweird.f32 %v529_v3 }
 0x10f   : > { %v1503_v4 = vpop.eup %1502 }
 0x110   : > { %v531_v5 = vmul.f32 %v1503_v4, %v529_v3  ;;  %vm537_vm6 = vweird.f32 %v1503_v4 }
 0x111   : > { %vm538_vm8 = vmor %vm536_vm7, %vm537_vm6 }
 0x112   : > { %v532_v6 = vmul.f32 %v1503_v4, %v531_v5 }
 0x114   : > { %v533_v7 = vmul.f32 0.5, %v532_v6 }
 0x116   : > { %v534_v8 = vsub.f32 1.5, %v533_v7 }
 0x118   : > { %v535_v13 = vmul.f32 %v1503_v4, %v534_v8 }
 0x11a   : > { %v539_v16 = vsel %vm538_vm8, %v1503_v4, %v535_v13 }
 0x11b   : > { %v540_v14 = vmul.f32 %v539_v16, %v511_v53  ;;  %v541_v11 = vmul.f32 %v539_v16, %v512_v54  ;;  %v542_v17 = vmul.f32 %v539_v16, %v513_v56  ;;  %v543_v18 = vmul.f32 %v539_v16, %v514_v57 }
 0x11d   : > { %v545_v19 = vmul.f32 %v1482_v15, %v540_v14  ;;  %v546_v20 = vmul.f32 %v1482_v15, %v541_v11  ;;  %v547_v26 = vmul.f32 %v1482_v15, %v542_v17  ;;  %v548_v28 = vmul.f32 %v1482_v15, %v543_v18 }
 0x11f   : > { %v550_v29 = vadd.f32 %v1483_v12, %v545_v19  ;;  %v551_v30 = vadd.f32 %v1483_v12, %v546_v20  ;;  %v552_v31 = vadd.f32 %v1483_v12, %v547_v26  ;;  %v553_v32 = vadd.f32 %v1483_v12, %v548_v28 }
 0x121   : > { %554 = vst [vmem:[#allocation2 + $0x20] sm:$0xff] %v550_v29 }
 0x122   : > { %555 = vst [vmem:[#allocation2 + $0x8] sm:$0xff] %v551_v30 }
 0x123   : > { %556 = vst [vmem:[#allocation2 + $0x10] sm:$0xff] %v552_v31 }
 0x124   : > { %557 = vst [vmem:[#allocation2 + $0x30] sm:$0xff] %v553_v32 }
 0x125 PF: > { %v1450_v23 = vld [vmem:[%s1649_s7 + $0x38] sm:$0xff]  ;;  %v580_v33 = vlaneseq  ;;  %v1449_v34 = vld [vmem:[%s1649_s7 + $0x30] sm:$0xff]  ;;  %v1740_v35 = vld [vmem:[#allocation2 + $0x28] sm:$0xff]  ;;  %p1432_p5 = scmp.ne.s32.totalorder %s1635_s22, 1 }
 0x126   : > { %1025 = vmatpush.bf16.msra.mxu0 %v1450_v23  ;;  %1452 = vmatpush.bf16.msra.mxu1 %v1450_v23  ;;  %v574_v38 = vrot.slane %v1740_v35, 4  ;;  %v596_v40 = vrot.slane %v1740_v35, 5  ;;  %v1750_v41 = vld [vmem:[#allocation2] sm:$0xff]  ;;  %v616_v47 = vrot.slane %v1740_v35, 6  ;;  %v1448_v21 = vld [vmem:[%s1649_s7 + $0x28] sm:$0xff]  ;;  %v1446_v14 = vld [vmem:[%s1649_s7 + $0x18] sm:$0xff] }
 0x127   : > { %v1742_v24 = vshrl.u32 %v580_v33, 7  ;;  %v1760_v45 = vld [vmem:[%s1644_s28] sm:$0xff]  ;;  %v577_v9 = vrot.slane %v1750_v41, 4  ;;  %v599_v27 = vrot.slane %v1750_v41, 5  ;;  %v619_v11 = vrot.slane %v1750_v41, 6 }
 0x128   : > { %v1744_v36 = vld [vmem:[#allocation2 + $0x20] sm:$0xff]  ;;  %v569_v48 = vperm.slane %v1760_v45, 4  ;;  %v587_v53 = vperm.slane %v1760_v45, 0  ;;  %v607_v13 = vperm.slane %v1760_v45, 1 }
 0x129   : > { %v1746_v37 = vld [vmem:[#allocation2 + $0x8] sm:$0xff]  ;;  %v575_v43 = vrot.slane %v1744_v36, 4  ;;  %vm582_vm9 = vcmp.lt.s32.totalorder %v1742_v24, 4  ;;  %v597_v54 = vrot.slane %v1744_v36, 5  ;;  %v1447_v63 = vld [vmem:[%s1649_s7 + $0x20] sm:$0xff]  ;;  %vm602_vm10 = vcmp.lt.s32.totalorder %v1742_v24, 3 }
 0x12a   : > { %v1752_v39 = vld [vmem:[#allocation2 + $0x10] sm:$0xff]  ;;  %v576_v44 = vrot.slane %v1746_v37, 4  ;;  %1026 = vmatpush.bf16.msra.mxu0 %v1449_v34  ;;  %1453 = vmatpush.bf16.msra.mxu1 %v1449_v34  ;;  %v598_v56 = vrot.slane %v1746_v37, 5  ;;  %v570_v57 = vmul.f32 %v569_v48, %v1744_v36  ;;  %v571_v22 = vmul.f32 %v569_v48, %v1746_v37 }
 0x12b   : > { %v1754_v42 = vld [vmem:[#allocation2 + $0x30] sm:$0xff]  ;;  %v578_v46 = vrot.slane %v1752_v39, 4  ;;  %v586_v51 = vsel %vm582_vm9, %v574_v38, %v575_v43  ;;  %v572_v58 = vmul.f32 %v569_v48, %v1752_v39  ;;  %v600_v50 = vrot.slane %v1752_v39, 5 }
 0x12c   : > { %v579_v49 = vrot.slane %v1754_v42, 4  ;;  %v1772_v10 = vsel %vm582_vm9, %v575_v43, %v576_v44  ;;  %v573_v59 = vmul.f32 %v569_v48, %v1754_v42  ;;  %v588_v61 = vmul.f32 %v587_v53, %v586_v51  ;;  %v1445_v38 = vld [vmem:[%s1649_s7 + $0x10] sm:$0xff]  ;;  %v1815_v51 = vld [vmem:[#allocation2 + $0x38] sm:$0xff] }
 0x12d   : > { %v584_v52 = vsel %vm582_vm9, %v577_v9, %v578_v46  ;;  %v589_v25 = vmul.f32 %v587_v53, %v1772_v10  ;;  %v601_v1 = vrot.slane %v1754_v42, 5  ;;  %v604_v6 = vsel %vm602_vm10, %v599_v27, %v600_v50 }
 0x12e   : > { %v1789_v60 = vsel %vm582_vm9, %v578_v46, %v579_v49  ;;  %v590_v62 = vmul.f32 %v587_v53, %v584_v52  ;;  %1027 = vmatpush.bf16.msra.mxu0 %v1448_v21  ;;  %1454 = vmatpush.bf16.msra.mxu1 %v1448_v21  ;;  %v592_v2 = vadd.f32 %v588_v61, %v570_v57  ;;  %v617_v15 = vrot.slane %v1744_v36, 6 }
 0x12f   : > { %v591_v0 = vmul.f32 %v587_v53, %v1789_v60  ;;  %v593_v55 = vadd.f32 %v589_v25, %v571_v22  ;;  %v603_v5 = vsel %vm602_vm10, %v600_v50, %v601_v1  ;;  %v605_v7 = vsel %vm602_vm10, %v597_v54, %v598_v56 }
 0x130   : > { %v594_v3 = vadd.f32 %v590_v62, %v572_v58  ;;  %v606_v8 = vsel %vm602_vm10, %v596_v40, %v597_v54  ;;  %v618_v16 = vrot.slane %v1746_v37, 6  ;;  %v620_v17 = vrot.slane %v1752_v39, 6 }
 0x131   : > { %v595_v4 = vadd.f32 %v591_v0, %v573_v59  ;;  %v621_v18 = vrot.slane %v1754_v42, 6  ;;  %vm622_vm11 = vcmp.lt.s32.totalorder %v1742_v24, 2  ;;  %v608_v12 = vmul.f32 %v607_v13, %v606_v8  ;;  %v1444_v59 = vld [vmem:[%s1649_s7 + $0x8] sm:$0xff]  ;;  %v1443_v8 = vld [vmem:[%s1649_s7] sm:$0xff] }
 0x132   : > { %1028 = vmatpush.bf16.msra.mxu0 %v1447_v63  ;;  %1455 = vmatpush.bf16.msra.mxu1 %v1447_v63  ;;  %v609_v19 = vmul.f32 %v607_v13, %v605_v7  ;;  %v610_v20 = vmul.f32 %v607_v13, %v604_v6  ;;  %v611_v26 = vmul.f32 %v607_v13, %v603_v5  ;;  %v627_v40 = vperm.slane %v1760_v45, 2 }
 0x133   : > { %v623_v28 = vsel %vm622_vm11, %v620_v17, %v621_v18  ;;  %v624_v29 = vsel %vm622_vm11, %v619_v11, %v620_v17  ;;  %v625_v30 = vsel %vm622_vm11, %v617_v15, %v618_v16  ;;  %v626_v31 = vsel %vm622_vm11, %v616_v47, %v617_v15 }
 0x134   : > { %v612_v32 = vadd.f32 %v608_v12, %v592_v2  ;;  %v613_v23 = vadd.f32 %v609_v19, %v593_v55  ;;  %v614_v33 = vadd.f32 %v610_v20, %v594_v3  ;;  %v615_v34 = vadd.f32 %v611_v26, %v595_v4 }
 0x135   : > { %v636_v43 = vrot.slane %v1740_v35, 7  ;;  %v637_v9 = vrot.slane %v1744_v36, 7  ;;  %v638_v46 = vrot.slane %v1746_v37, 7  ;;  %v639_v21 = vrot.slane %v1750_v41, 7  ;;  %v1818_v41 = vld [vmem:[#allocation2 + $0x18] sm:$0xff] }
 0x136   : > { %1029 = vmatpush.bf16.msra.mxu0 %v1446_v14  ;;  %1456 = vmatpush.bf16.msra.mxu1 %v1446_v14  ;;  %v640_v47 = vrot.slane %v1752_v39, 7  ;;  %v641_v48 = vrot.slane %v1754_v42, 7  ;;  %vm642_vm12 = vcmp.lt.s32.totalorder %v1742_v24, 1  ;;  %v628_v52 = vmul.f32 %v627_v40, %v626_v31 }
 0x137   : > { %v629_v53 = vmul.f32 %v627_v40, %v625_v30  ;;  %v630_v54 = vmul.f32 %v627_v40, %v624_v29  ;;  %v631_v56 = vmul.f32 %v627_v40, %v623_v28  ;;  %v645_v22 = vsel %vm642_vm12, %v637_v9, %v638_v46 }
 0x138   : > { %v643_v35 = vsel %vm642_vm12, %v640_v47, %v641_v48  ;;  %v644_v57 = vsel %vm642_vm12, %v639_v21, %v640_v47  ;;  %v646_v58 = vsel %vm642_vm12, %v636_v43, %v637_v9  ;;  %v632_v61 = vadd.f32 %v628_v52, %v612_v32 }
 0x139   : > { %v633_v25 = vadd.f32 %v629_v53, %v613_v23  ;;  %v634_v62 = vadd.f32 %v630_v54, %v614_v33  ;;  %v647_v63 = vperm.slane %v1760_v45, 3  ;;  %v635_v0 = vadd.f32 %v631_v56, %v615_v34 }
 0x13a   : > { %1030 = vmatpush.bf16.msra.mxu0 %v1445_v38  ;;  %1457 = vmatpush.bf16.msra.mxu1 %v1445_v38  ;;  %v656_v27 = vrot.slane %v1744_v36, 1  ;;  %v657_v50 = vrot.slane %v1746_v37, 1  ;;  %v658_v1 = vrot.slane %v1815_v51, 1  ;;  %v659_v5 = vrot.slane %v1752_v39, 1 }
 0x13b   : > { %v648_v2 = vmul.f32 %v647_v63, %v646_v58  ;;  %v649_v55 = vmul.f32 %v647_v63, %v645_v22  ;;  %v650_v3 = vmul.f32 %v647_v63, %v644_v57  ;;  %v651_v4 = vmul.f32 %v647_v63, %v643_v35 }
 0x13c   : > { %v660_v6 = vrot.slane %v1754_v42, 1  ;;  %v661_v7 = vrot.slane %v1818_v41, 1  ;;  %vm662_vm13 = vcmp.lt.s32.totalorder %v1742_v24, 7  ;;  %v667_v14 = vperm.slane %v1760_v45, 5 }
 0x13d   : > { %v652_v13 = vadd.f32 %v648_v2, %v632_v61  ;;  %v653_v15 = vadd.f32 %v649_v55, %v633_v25  ;;  %v654_v16 = vadd.f32 %v650_v3, %v634_v62  ;;  %v655_v11 = vadd.f32 %v651_v4, %v635_v0  ;;  %v1504_v62 = vld [vmem:[%s1644_s28 + $0x8] ss:$0 sm:$0xff]  ;;  %v1847_v3 = vld [vmem:[%s1654_s11] sm:$0xff] }
 0x13e   : > { %1031 = vmatpush.bf16.msra.mxu0 %v1444_v59  ;;  %1458 = vmatpush.bf16.msra.mxu1 %v1444_v59  ;;  %v663_v17 = vsel %vm662_vm13, %v660_v6, %v661_v7  ;;  %v664_v18 = vsel %vm662_vm13, %v659_v5, %v660_v6  ;;  %v665_v12 = vsel %vm662_vm13, %v657_v50, %v658_v1  ;;  %v676_v30 = vrot.slane %v1744_v36, 2 }
 0x13f   : > { %v666_v19 = vsel %vm662_vm13, %v656_v27, %v657_v50  ;;  %v669_v20 = vmul.f32 %v667_v14, %v665_v12  ;;  %v670_v26 = vmul.f32 %v667_v14, %v664_v18  ;;  %v671_v28 = vmul.f32 %v667_v14, %v663_v17 }
 0x140   : > { %v668_v29 = vmul.f32 %v667_v14, %v666_v19  ;;  %v677_v31 = vrot.slane %v1746_v37, 2  ;;  %v678_v32 = vrot.slane %v1815_v51, 2  ;;  %v679_v38 = vrot.slane %v1752_v39, 2 }
 0x141   : > { %v673_v23 = vadd.f32 %v669_v20, %v653_v15  ;;  %v674_v33 = vadd.f32 %v670_v26, %v654_v16  ;;  %v675_v34 = vadd.f32 %v671_v28, %v655_v11  ;;  %v680_v43 = vrot.slane %v1754_v42, 2 }
 0x142   : > { %1032 = vmatpush.bf16.msra.mxu0 %v1443_v8  ;;  %1459 = vmatpush.bf16.msra.mxu1 %v1443_v8  ;;  %v672_v40 = vadd.f32 %v668_v29, %v652_v13  ;;  %v681_v9 = vrot.slane %v1818_v41, 2  ;;  %vm682_vm14 = vcmp.lt.s32.totalorder %v1742_v24, 6  ;;  %v687_v47 = vperm.slane %v1760_v45, 6 }
 0x143   : > { %v685_v46 = vsel %vm682_vm14, %v677_v31, %v678_v32  ;;  %v686_v21 = vsel %vm682_vm14, %v676_v30, %v677_v31  ;;  %v696_v48 = vrot.slane %v1744_v36, 3  ;;  %v684_v53 = vsel %vm682_vm14, %v679_v38, %v680_v43 }
 0x144   : > { %v683_v52 = vsel %vm682_vm14, %v680_v43, %v681_v9  ;;  %v697_v54 = vrot.slane %v1746_v37, 3  ;;  %v698_v56 = vrot.slane %v1815_v51, 3  ;;  %v688_v35 = vmul.f32 %v687_v47, %v686_v21 }
 0x145   : > { %v689_v57 = vmul.f32 %v687_v47, %v685_v46  ;;  %v690_v22 = vmul.f32 %v687_v47, %v684_v53  ;;  %v691_v58 = vmul.f32 %v687_v47, %v683_v52  ;;  %v699_v59 = vrot.slane %v1752_v39, 3 }
 0x146   : > { %v700_v61 = vrot.slane %v1754_v42, 3  ;;  %v701_v25 = vrot.slane %v1818_v41, 3  ;;  %vm702_vm15 = vcmp.lt.s32.totalorder %v1742_v24, 5  ;;  %v692_v63 = vadd.f32 %v688_v35, %v672_v40 }
 0x147   : > { %v693_v0 = vadd.f32 %v689_v57, %v673_v23  ;;  %v694_v27 = vadd.f32 %v690_v22, %v674_v33  ;;  %v705_v2 = vsel %vm702_vm15, %v697_v54, %v698_v56  ;;  %v706_v55 = vsel %vm702_vm15, %v696_v48, %v697_v54 }
 0x148   : > { %v703_v50 = vsel %vm702_vm15, %v700_v61, %v701_v25  ;;  %v704_v1 = vsel %vm702_vm15, %v699_v59, %v700_v61  ;;  %v695_v4 = vadd.f32 %v691_v58, %v675_v34  ;;  %v707_v5 = vperm.slane %v1760_v45, 7 }
 0x149   : > { %v716_v6 = vrot.slane %v1815_v51, 4  ;;  %v717_v7 = vrot.slane %v1818_v41, 4  ;;  %v721_v8 = vmul.f32 %v1504_v62, %v1772_v10  ;;  %v723_v13 = vmul.f32 %v1504_v62, %v1789_v60 }
 0x14a   : > { %v708_v15 = vmul.f32 %v707_v5, %v706_v55  ;;  %v709_v16 = vmul.f32 %v707_v5, %v705_v2  ;;  %v710_v14 = vmul.f32 %v707_v5, %v704_v1  ;;  %v711_v11 = vmul.f32 %v707_v5, %v703_v50 }
 0x14b   : > { %v718_v17 = vsel %vm582_vm9, %v579_v49, %v717_v7  ;;  %v719_v45 = vsel %vm582_vm9, %v576_v44, %v716_v6  ;;  %v729_v51 = vperm.slane %v1847_v3, 0 }
 0x14c   : > { %v712_v41 = vadd.f32 %v708_v15, %v692_v63  ;;  %v713_v10 = vadd.f32 %v709_v16, %v693_v0  ;;  %v714_v18 = vadd.f32 %v710_v14, %v694_v27  ;;  %v715_v60 = vadd.f32 %v711_v11, %v695_v4 }
 0x14d   : > { %v722_v12 = vmul.f32 %v1504_v62, %v719_v45  ;;  %v724_v19 = vmul.f32 %v1504_v62, %v718_v17 }
 0x14e   : > { %v725_v20 = vadd.f32 %v721_v8, %v712_v41  ;;  %v727_v26 = vadd.f32 %v723_v13, %v714_v18 }
 0x14f   : > { %v726_v28 = vadd.f32 %v722_v12, %v713_v10  ;;  %v728_v29 = vadd.f32 %v724_v19, %v715_v60 }
 0x150   : > { %v1863_v30 = vadd.f32 %v729_v51, %v725_v20  ;;  %v1865_v49 = vadd.f32 %v729_v51, %v727_v26 }
 0x151   : > { %v1867_v31 = vadd.f32 %v729_v51, %v726_v28  ;;  %v1869_v24 = vadd.f32 %v729_v51, %v728_v29 }
 0x152   : > { %v1872_v44 = vmul.f32 0.70710677, %v1863_v30  ;;  %v1875_v32 = vmul.f32 0.70710677, %v1865_v49 }
 0x153   : > { %v1878_v23 = vmul.f32 0.70710677, %v1867_v31  ;;  %v1881_v33 = vmul.f32 0.70710677, %v1869_v24 }
 0x154   : > { %v1884_v34 = vand.u32 2147483647, %v1872_v44  ;;  %v1887_v38 = vand.u32 2147483647, %v1875_v32 }
 0x155   : > { %v1890_v40 = vand.u32 2147483647, %v1878_v23  ;;  %v1893_v43 = vand.u32 2147483647, %v1881_v33 }
 0x156   : > { %v754_v9 = vmul.f32 0.3275911, %v1884_v34  ;;  %v756_v46 = vmul.f32 0.3275911, %v1887_v38  ;;  %v858_v58 = vsub.f32 0.0, %v1884_v34  ;;  %v860_v59 = vsub.f32 0.0, %v1887_v38 }
 0x157   : > { %v755_v21 = vmul.f32 0.3275911, %v1890_v40  ;;  %v757_v47 = vmul.f32 0.3275911, %v1893_v43  ;;  %v859_v19 = vsub.f32 0.0, %v1890_v40 }
 0x158   : > { %v758_v48 = vadd.f32 1.0, %v754_v9  ;;  %v760_v52 = vadd.f32 1.0, %v756_v46 }
 0x159   : > { %v759_v53 = vadd.f32 1.0, %v755_v21  ;;  %v761_v54 = vadd.f32 1.0, %v757_v47 }
 0x15a   : > { %1505 = vrcp.f32 %v758_v48  ;;  %v771_v56 = vand.u32 2147483647, %v758_v48  ;;  %v773_v35 = vand.u32 2147483648, %v758_v48  ;;  %vm767_vm0 = vweird.f32 %v758_v48 }
 0x15b   : > { %1507 = vrcp.f32 %v759_v53  ;;  %v788_v57 = vand.u32 2147483648, %v759_v53  ;;  %vm782_vm1 = vweird.f32 %v759_v53  ;;  %v786_v62 = vand.u32 2147483647, %v759_v53 }
 0x15c   : > { %1509 = vrcp.f32 %v760_v52  ;;  %vm1901_vm2 = vcmp.eq.f32.partialorder %v771_v56, 8.507059e+37  ;;  %v774_v27 = vor.u32 1.1754944e-38, %v773_v35  ;;  %vm797_vm3 = vweird.f32 %v760_v52 }
 0x15d   : > { %1511 = vrcp.f32 %v761_v54  ;;  %v789_v2 = vor.u32 1.1754944e-38, %v788_v57  ;;  %v801_v6 = vand.u32 2147483647, %v760_v52  ;;  %v803_v7 = vand.u32 2147483648, %v760_v52 }
 0x15e   : > { %vm812_vm8 = vweird.f32 %v761_v54  ;;  %v816_v11 = vand.u32 2147483647, %v761_v54  ;;  %v818_v17 = vand.u32 2147483648, %v761_v54  ;;  %vm787_vm11 = vcmp.eq.f32.partialorder %v786_v62, 8.507059e+37 }
 0x15f   : > { %v804_v12 = vor.u32 1.1754944e-38, %v803_v7  ;;  %vm802_vm13 = vcmp.eq.f32.partialorder %v801_v6, 8.507059e+37  ;;  %v861_v57 = vsub.f32 0.0, %v1893_v43  ;;  %v863_v62 = vmul.f32 %v859_v19, %v1890_v40 }
 0x160   : > { %v1506_v22 = vpop.eup %1505  ;;  %vm817_vm15 = vcmp.eq.f32.partialorder %v816_v11, 8.507059e+37  ;;  %v819_v21 = vor.u32 1.1754944e-38, %v818_v17 }
 0x161   : > { %v1508_v61 = vpop.eup %1507  ;;  %v763_v25 = vmul.f32 %v1506_v22, %v758_v48  ;;  %vm768_vm4 = vweird.f32 %v1506_v22 }
 0x162   : > { %v1510_v63 = vpop.eup %1509  ;;  %v778_v50 = vmul.f32 %v1508_v61, %v759_v53  ;;  %vm783_vm5 = vweird.f32 %v1508_v61  ;;  %vm1906_vm7 = vmor %vm767_vm0, %vm768_vm4  ;;  %vm742_vm0 = vcmp.ge.f32.partialorder %v1872_v44, 0.0 }
 0x163   : > { %v764_v1 = vsub.f32 1.0, %v763_v25  ;;  %v793_v55 = vmul.f32 %v1510_v63, %v760_v52  ;;  %v1512_v4 = vpop.eup %1511  ;;  %vm798_vm6 = vweird.f32 %v1510_v63  ;;  %vm1911_vm9 = vmor %vm782_vm1, %vm783_vm5  ;;  %vm743_vm1 = vcmp.ge.f32.partialorder %v1878_v23, 0.0 }
 0x164   : > { %v779_v5 = vsub.f32 1.0, %v778_v50  ;;  %v808_v15 = vmul.f32 %v1512_v4, %v761_v54  ;;  %vm813_vm10 = vweird.f32 %v1512_v4  ;;  %vm1916_vm12 = vmor %vm797_vm3, %vm798_vm6  ;;  %v864_v50 = vmul.f32 %v860_v59, %v1887_v38 }
 0x165   : > { %v765_v8 = vmul.f32 %v1506_v22, %v764_v1  ;;  %v794_v13 = vsub.f32 1.0, %v793_v55  ;;  %vm1928_vm14 = vmor %vm812_vm8, %vm813_vm10  ;;  %vm745_vm3 = vcmp.ge.f32.partialorder %v1881_v33, 0.0 }
 0x166   : > { %v780_v14 = vmul.f32 %v1508_v61, %v779_v5  ;;  %v809_v10 = vsub.f32 1.0, %v808_v15  ;;  %v865_v5 = vmul.f32 %v861_v57, %v1893_v43 }
 0x167   : > { %v766_v45 = vadd.f32 %v1506_v22, %v765_v8  ;;  %v795_v41 = vmul.f32 %v1510_v63, %v794_v13  ;;  %v868_v8 = vmul.f32 1.442695, %v863_v62  ;;  %v870_v13 = vmul.f32 1.442695, %v864_v50 }
 0x168   : > { %v781_v18 = vadd.f32 %v1508_v61, %v780_v14  ;;  %v810_v28 = vmul.f32 %v1512_v4, %v809_v10  ;;  %v872_v11 = vmul.f32 1.442695, %v865_v5  ;;  %v736_v5 = vmul.f32 0.5, %v1865_v49 }
 0x169   : > { %v770_v20 = vsel %vm1906_vm7, %v1506_v22, %v766_v45  ;;  %v796_v26 = vadd.f32 %v1510_v63, %v795_v41  ;;  %v862_v22 = vmul.f32 %v858_v58, %v1884_v34 }
 0x16a   : > { %v775_v29 = vsel %vm1901_vm2, %v774_v27, %v770_v20  ;;  %v785_v9 = vsel %vm1911_vm9, %v1508_v61, %v781_v18  ;;  %v811_v52 = vadd.f32 %v1512_v4, %v810_v28  ;;  %vm744_vm2 = vcmp.ge.f32.partialorder %v1875_v32, 0.0 }
 0x16b   : > { %v790_v47 = vsel %vm787_vm11, %v789_v2, %v785_v9  ;;  %v800_v48 = vsel %vm1916_vm12, %v1510_v63, %v796_v26  ;;  %v822_v53 = vmul.f32 1.0614054, %v775_v29  ;;  %v866_v6 = vmul.f32 1.442695, %v862_v22 }
 0x16c   : > { %v805_v56 = vsel %vm802_vm13, %v804_v12, %v800_v48  ;;  %v823_v35 = vmul.f32 1.0614054, %v790_v47  ;;  %v815_v54 = vsel %vm1928_vm14, %v1512_v4, %v811_v52  ;;  %v1590_v22 = vmov -1.0  }
 0x16d   : > { %v824_v61 = vmul.f32 1.0614054, %v805_v56  ;;  %v826_v25 = vadd.f32 -1.4531521, %v822_v53  ;;  %v820_v0 = vsel %vm817_vm15, %v819_v21, %v815_v54  ;;  %1513 = vpow2.f32 %v866_v6 }
 0x16e   : > { %v827_v27 = vadd.f32 -1.4531521, %v823_v35  ;;  %v825_v63 = vmul.f32 1.0614054, %v820_v0  ;;  %1515 = vpow2.f32 %v868_v8  ;;  %v746_v54 = vsel %vm742_vm0, 1.0, %v1590_v22 }
 0x16f   : > { %v828_v1 = vadd.f32 -1.4531521, %v824_v61  ;;  %v830_v2 = vmul.f32 %v826_v25, %v775_v29  ;;  %1517 = vpow2.f32 %v870_v13  ;;  %v1591_v25 = vmov 32.0  }
 0x170   : > { %v831_v55 = vmul.f32 %v827_v27, %v790_v47  ;;  %v829_v7 = vadd.f32 -1.4531521, %v825_v63  ;;  %1519 = vpow2.f32 %v872_v11  ;;  %v748_v32 = vsel %vm744_vm2, 1.0, %v1590_v22 }
 0x171   : > { %v832_v34 = vmul.f32 %v828_v1, %v805_v56  ;;  %v834_v58 = vadd.f32 1.4214138, %v830_v2  ;;  %1521 = vrcp.f32 %v1591_v25  ;;  %v734_v27 = vmul.f32 0.5, %v1863_v30 }
 0x172   : > { %v835_v4 = vadd.f32 1.4214138, %v831_v55  ;;  %v833_v15 = vmul.f32 %v829_v7, %v820_v0  ;;  %v735_v2 = vmul.f32 0.5, %v1867_v31  ;;  %v749_v44 = vsel %vm745_vm3, 1.0, %v1590_v22 }
 0x173   : > { %v836_v16 = vadd.f32 1.4214138, %v832_v34  ;;  %v838_v40 = vmul.f32 %v834_v58, %v775_v29  ;;  %v1514_v19 = vpop.eup %1513  ;;  %v737_v8 = vmul.f32 0.5, %v1869_v24 }
 0x174   : > { %v839_v14 = vmul.f32 %v835_v4, %v790_v47  ;;  %v837_v38 = vadd.f32 1.4214138, %v833_v15  ;;  %v1516_v26 = vpop.eup %1515 }
 0x175   : > { %v840_v59 = vmul.f32 %v836_v16, %v805_v56  ;;  %v842_v17 = vadd.f32 -0.28449672, %v838_v40  ;;  %v1518_v21 = vpop.eup %1517 }
 0x176   : > { %v843_v45 = vadd.f32 -0.28449672, %v839_v14  ;;  %v841_v43 = vmul.f32 %v837_v38, %v820_v0  ;;  %v1520_v57 = vpop.eup %1519 }
 0x177   : > { %v844_v51 = vadd.f32 -0.28449672, %v840_v59  ;;  %v846_v41 = vmul.f32 %v842_v17, %v775_v29  ;;  %v1522_v34 = vpop.eup %1521 }
 0x178   : > { %v847_v10 = vmul.f32 %v843_v45, %v790_v47  ;;  %v845_v18 = vadd.f32 -0.28449672, %v841_v43  ;;  %v904_v40 = vmul.f32 32.0, %v1522_v34  ;;  %vm908_vm4 = vweird.f32 %v1522_v34 }
 0x179   : > { %v848_v60 = vmul.f32 %v844_v51, %v805_v56  ;;  %v850_v12 = vadd.f32 0.2548296, %v846_v41 }
 0x17a   : > { %v851_v20 = vadd.f32 0.2548296, %v847_v10  ;;  %v849_v28 = vmul.f32 %v845_v18, %v820_v0  ;;  %v905_v38 = vsub.f32 1.0, %v904_v40 }
 0x17b   : > { %v852_v9 = vadd.f32 0.2548296, %v848_v60  ;;  %v854_v46 = vmul.f32 %v850_v12, %v775_v29  ;;  %v747_v29 = vsel %vm743_vm1, 1.0, %v1590_v22 }
 0x17c   : > { %v855_v48 = vmul.f32 %v851_v20, %v790_v47  ;;  %v853_v52 = vadd.f32 0.2548296, %v849_v28  ;;  %v906_v17 = vmul.f32 %v1522_v34, %v905_v38  ;;  %v976_v38 = vperm.slane %v1847_v3, 3 }
 0x17d   : > { %v856_v53 = vmul.f32 %v852_v9, %v805_v56  ;;  %v874_v35 = vmul.f32 %v1514_v19, %v854_v46 }
 0x17e   : > { %v875_v61 = vmul.f32 %v1516_v26, %v855_v48  ;;  %v857_v23 = vmul.f32 %v853_v52, %v820_v0  ;;  %v907_v51 = vadd.f32 %v1522_v34, %v906_v17 }
 0x17f   : > { %v876_v47 = vmul.f32 %v1518_v21, %v856_v53  ;;  %v878_v62 = vsub.f32 1.0, %v874_v35 }
 0x180   : > { %v879_v56 = vsub.f32 1.0, %v875_v61  ;;  %v877_v50 = vmul.f32 %v1520_v57, %v857_v23  ;;  %v1957_v10 = vsel %vm908_vm4, %v1522_v34, %v907_v51 }
 0x181   : > { %v880_v63 = vsub.f32 1.0, %v876_v47  ;;  %v882_v1 = vmul.f32 %v878_v62, %v746_v54 }
 0x182   : > { %v883_v55 = vmul.f32 %v879_v56, %v747_v29  ;;  %v881_v0 = vsub.f32 1.0, %v877_v50 }
 0x183   : > { %v884_v6 = vmul.f32 %v880_v63, %v748_v32  ;;  %v886_v7 = vadd.f32 1.0, %v882_v1  ;;  %v944_v1 = vperm.slane %v1847_v3, 1 }
 0x184   : > { %v887_v58 = vadd.f32 1.0, %v883_v55  ;;  %v885_v30 = vmul.f32 %v881_v0, %v749_v44  ;;  %v949_v44 = vperm.slane %v1847_v3, 2 }
 0x185   : > { %v888_v4 = vadd.f32 1.0, %v884_v6  ;;  %v890_v13 = vmul.f32 %v886_v7, %v734_v27 }
 0x186   : > { %v891_v15 = vmul.f32 %v887_v58, %v735_v2  ;;  %v889_v16 = vadd.f32 1.0, %v885_v30 }
 0x187   : > { %v892_v31 = vmul.f32 %v888_v4, %v736_v5 }
 0x188   : > { %v894_v14 = vadd.f32 %v891_v15, %v890_v13  ;;  %v893_v33 = vmul.f32 %v889_v16, %v737_v8 }
 0x18a   : > { %v895_v11 = vadd.f32 %v894_v14, %v892_v31 }
 0x18c   : > { %v896_v59 = vadd.f32 %v895_v11, %v893_v33 }
 0x18e   : > { %v897_v49 = vrot.slane %v896_v59, 4 }
 0x190   : > { %v898_v45 = vadd.f32 %v897_v49, %v896_v59 }
 0x192   : > { %v899_v43 = vrot.slane %v898_v45, 2 }
 0x194   : > { %v900_v41 = vadd.f32 %v899_v43, %v898_v45 }
 0x196   : > { %v901_v24 = vrot.slane %v900_v41, 1 }
 0x198   : > { %v902_v18 = vadd.f32 %v901_v24, %v900_v41 }
 0x19a   : > { %v910_v60 = vmul.f32 %v1957_v10, %v902_v18 }
 0x19c   : > { %v911_v12 = vsub.f32 %v890_v13, %v910_v60  ;;  %v912_v19 = vsub.f32 %v891_v15, %v910_v60  ;;  %v913_v20 = vsub.f32 %v892_v31, %v910_v60  ;;  %v914_v26 = vsub.f32 %v893_v33, %v910_v60 }
 0x19e   : > { %v915_v28 = vmul.f32 %v911_v12, %v911_v12  ;;  %v916_v9 = vmul.f32 %v912_v19, %v912_v19  ;;  %v917_v46 = vmul.f32 %v913_v20, %v913_v20  ;;  %v918_v21 = vmul.f32 %v914_v26, %v914_v26 }
 0x1a0   : > { %v919_v48 = vadd.f32 %v916_v9, %v915_v28 }
 0x1a2   : > { %v920_v52 = vadd.f32 %v919_v48, %v917_v46 }
 0x1a4   : > { %v921_v53 = vadd.f32 %v920_v52, %v918_v21 }
 0x1a6   : > { %v922_v35 = vrot.slane %v921_v53, 4 }
 0x1a8   : > { %v923_v57 = vadd.f32 %v922_v35, %v921_v53 }
 0x1aa   : > { %v924_v54 = vrot.slane %v923_v57, 2 }
 0x1ac   : > { %v925_v61 = vadd.f32 %v924_v54, %v923_v57 }
 0x1ae   : > { %v926_v25 = vrot.slane %v925_v61, 1 }
 0x1b0   : > { %v927_v29 = vadd.f32 %v926_v25, %v925_v61 }
 0x1b2   : > { %v928_v23 = vmul.f32 %v927_v29, %v1957_v10 }
 0x1b4   : > { %v929_v47 = vadd.f32 1e-05, %v928_v23 }
 0x1b6   : > { %1523 = vrsqrt.f32 %v929_v47  ;;  %vm936_vm5 = vweird.f32 %v929_v47 }
 0x1bc   : > { %v1524_v62 = vpop.eup %1523 }
 0x1bd   : > { %v931_v32 = vmul.f32 %v1524_v62, %v929_v47  ;;  %vm937_vm6 = vweird.f32 %v1524_v62 }
 0x1be   : > { %vm938_vm7 = vmor %vm936_vm5, %vm937_vm6 }
 0x1bf   : > { %v932_v56 = vmul.f32 %v1524_v62, %v931_v32 }
 0x1c1   : > { %v933_v27 = vmul.f32 0.5, %v932_v56 }
 0x1c3   : > { %v934_v50 = vsub.f32 1.5, %v933_v27 }
 0x1c5   : > { %v935_v63 = vmul.f32 %v1524_v62, %v934_v50 }
 0x1c7   : > { %v939_v2 = vsel %vm938_vm7, %v1524_v62, %v935_v63 }
 0x1c8   : > { %v940_v55 = vmul.f32 %v939_v2, %v911_v12  ;;  %v941_v5 = vmul.f32 %v939_v2, %v912_v19  ;;  %v942_v0 = vmul.f32 %v939_v2, %v913_v20  ;;  %v943_v6 = vmul.f32 %v939_v2, %v914_v26 }
 0x1ca   : > { %v945_v7 = vmul.f32 %v944_v1, %v940_v55  ;;  %v946_v34 = vmul.f32 %v944_v1, %v941_v5  ;;  %v947_v58 = vmul.f32 %v944_v1, %v942_v0  ;;  %v948_v8 = vmul.f32 %v944_v1, %v943_v6 }
 0x1cc   : > { %v950_v30 = vadd.f32 %v949_v44, %v945_v7  ;;  %v951_v4 = vadd.f32 %v949_v44, %v946_v34  ;;  %v952_v13 = vadd.f32 %v949_v44, %v947_v58  ;;  %v953_v15 = vadd.f32 %v949_v44, %v948_v8 }
 0x1ce   : > { %v954_v16 = vadd.f32 %v950_v30, %v1744_v36  ;;  %v955_v31 = vadd.f32 %v951_v4, %v1746_v37  ;;  %v956_v40 = vadd.f32 %v952_v13, %v1752_v39  ;;  %v957_v14 = vadd.f32 %v953_v15, %v1754_v42 }
 0x1d0   : > { %v958_v33 = vpack.c.bf16 %v955_v31, %v954_v16  ;;  %v959_v11 = vpack.c.bf16 %v957_v14, %v956_v40 }
 0x1d2   : > { %1033 = vmatmul.bf16.vlgmr.msra.gmra.mxu0 %v958_v33  ;;  %1038 = vmatmul.bf16.vlgmr.msra.gmra.mxu1 %v959_v11 }
 0x24f   : > { %v1034_v59 = vpop.f32.mrf.mxu0  ;;  %v1039_v49 = vpop.f32.mrf.mxu1 }
 0x250   : > { %v1968_v17 = vadd.f32 %v1034_v59, %v976_v38  ;;  %v1970_v45 = vadd.f32 %v1039_v49, %v976_v38 }
 0x252   : > { %v1973_v36 = vmul.f32 0.70710677, %v1968_v17  ;;  %v1976_v37 = vmul.f32 0.70710677, %v1970_v45 }
 0x254   : > { %v1060_v39 = vand.u32 2147483647, %v1973_v36  ;;  %v1062_v42 = vand.u32 2147483647, %v1976_v37 }
 0x256   : > { %v1064_v43 = vmul.f32 0.3275911, %v1060_v39  ;;  %v1066_v51 = vmul.f32 0.3275911, %v1062_v42  ;;  %v1168_v54 = vsub.f32 0.0, %v1060_v39  ;;  %v1170_v55 = vsub.f32 0.0, %v1062_v42 }
 0x257   : > { %v1036_v41 = vpop.f32.mrf.mxu0  ;;  %v1041_v24 = vpop.f32.mrf.mxu1 }
 0x258   : > { %v1068_v18 = vadd.f32 1.0, %v1064_v43  ;;  %v1070_v60 = vadd.f32 1.0, %v1066_v51  ;;  %v1980_v12 = vadd.f32 %v1036_v41, %v976_v38  ;;  %v1982_v19 = vadd.f32 %v1041_v24, %v976_v38 }
 0x259   : > { %v1172_v0 = vmul.f32 %v1168_v54, %v1060_v39  ;;  %v1174_v40 = vmul.f32 %v1170_v55, %v1062_v42 }
 0x25a   : > { %1525 = vrcp.f32 %v1068_v18  ;;  %v1985_v20 = vmul.f32 0.70710677, %v1980_v12  ;;  %v1988_v26 = vmul.f32 0.70710677, %v1982_v19  ;;  %v1081_v25 = vand.u32 2147483647, %v1068_v18 }
 0x25b   : > { %1527 = vrcp.f32 %v1070_v60  ;;  %v1083_v29 = vand.u32 2147483648, %v1068_v18  ;;  %v1113_v32 = vand.u32 2147483648, %v1070_v60  ;;  %v1111_v27 = vand.u32 2147483647, %v1070_v60 }
 0x25c   : > { %v1991_v28 = vand.u32 2147483647, %v1985_v20  ;;  %v1994_v46 = vand.u32 2147483647, %v1988_v26  ;;  %vm1077_vm10 = vweird.f32 %v1068_v18  ;;  %vm1107_vm12 = vweird.f32 %v1070_v60 }
 0x25d   : > { %v1084_v63 = vor.u32 1.1754944e-38, %v1083_v29  ;;  %vm1082_vm13 = vcmp.eq.f32.partialorder %v1081_v25, 8.507059e+37  ;;  %v1114_v44 = vor.u32 1.1754944e-38, %v1113_v32  ;;  %vm1112_vm15 = vcmp.eq.f32.partialorder %v1111_v27, 8.507059e+37 }
 0x25e   : > { %v1065_v52 = vmul.f32 0.3275911, %v1991_v28  ;;  %v1067_v35 = vmul.f32 0.3275911, %v1994_v46  ;;  %v1176_v16 = vmul.f32 1.442695, %v1172_v0 }
 0x260   : > { %v1526_v9 = vpop.eup %1525  ;;  %v1998_v61 = vadd.f32 1.0, %v1065_v52  ;;  %v2000_v47 = vadd.f32 1.0, %v1067_v35 }
 0x261   : > { %v1528_v21 = vpop.eup %1527  ;;  %v1073_v48 = vmul.f32 %v1526_v9, %v1068_v18  ;;  %vm1078_vm8 = vweird.f32 %v1526_v9 }
 0x262   : > { %v1103_v53 = vmul.f32 %v1528_v21, %v1070_v60  ;;  %1529 = vrcp.f32 %v1998_v61  ;;  %vm1108_vm9 = vweird.f32 %v1528_v21  ;;  %vm1079_vm11 = vmor %vm1077_vm10, %vm1078_vm8  ;;  %v1096_v11 = vand.u32 2147483647, %v1998_v61 }
 0x263   : > { %v1074_v57 = vsub.f32 1.0, %v1073_v48  ;;  %1531 = vrcp.f32 %v2000_v47  ;;  %vm1109_vm14 = vmor %vm1107_vm12, %vm1108_vm9  ;;  %v1098_v38 = vand.u32 2147483648, %v1998_v61  ;;  %v1128_v43 = vand.u32 2147483648, %v2000_v47 }
 0x264   : > { %v1104_v23 = vsub.f32 1.0, %v1103_v53  ;;  %v1126_v24 = vand.u32 2147483647, %v2000_v47  ;;  %vm1092_vm2 = vweird.f32 %v1998_v61  ;;  %v1169_v60 = vsub.f32 0.0, %v1991_v28 }
 0x265   : > { %v1075_v62 = vmul.f32 %v1526_v9, %v1074_v57  ;;  %vm1122_vm4 = vweird.f32 %v2000_v47  ;;  %vm1097_vm5 = vcmp.eq.f32.partialorder %v1096_v11, 8.507059e+37  ;;  %v1129_v35 = vor.u32 1.1754944e-38, %v1128_v43 }
 0x266   : > { %v1105_v56 = vmul.f32 %v1528_v21, %v1104_v23  ;;  %vm1127_vm7 = vcmp.eq.f32.partialorder %v1126_v24, 8.507059e+37  ;;  %1533 = vpow2.f32 %v1176_v16  ;;  %vm1052_vm8 = vcmp.ge.f32.partialorder %v1973_v36, 0.0 }
 0x267   : > { %v1076_v50 = vadd.f32 %v1526_v9, %v1075_v62  ;;  %v1171_v62 = vsub.f32 0.0, %v1994_v46  ;;  %vm1054_vm9 = vcmp.ge.f32.partialorder %v1976_v37, 0.0  ;;  %vm1053_vm10 = vcmp.ge.f32.partialorder %v1985_v20, 0.0 }
 0x268   : > { %v1106_v1 = vadd.f32 %v1528_v21, %v1105_v56  ;;  %v1530_v7 = vpop.eup %1529  ;;  %v1180_v56 = vmul.f32 1.442695, %v1174_v40  ;;  %v1057_v37 = vsel %vm1053_vm10, 1.0, %v1590_v22  ;;  %v1045_v20 = vmul.f32 0.5, %v1980_v12 }
 0x269   : > { %v1080_v2 = vsel %vm1079_vm11, %v1526_v9, %v1076_v50  ;;  %v1532_v8 = vpop.eup %1531  ;;  %v1088_v4 = vmul.f32 %v1530_v7, %v1998_v61  ;;  %vm1093_vm0 = vweird.f32 %v1530_v7  ;;  %v1175_v0 = vmul.f32 %v1171_v62, %v1994_v46 }
 0x26a   : > { %v2004_v5 = vsel %vm1082_vm13, %v1084_v63, %v1080_v2  ;;  %v1110_v6 = vsel %vm1109_vm14, %v1528_v21, %v1106_v1  ;;  %v1118_v15 = vmul.f32 %v1532_v8, %v2000_v47  ;;  %vm1123_vm1 = vweird.f32 %v1532_v8  ;;  %vm1094_vm3 = vmor %vm1092_vm2, %vm1093_vm0 }
 0x26b   : > { %v1132_v34 = vmul.f32 1.0614054, %v2004_v5  ;;  %v1115_v58 = vsel %vm1112_vm15, %v1114_v44, %v1110_v6  ;;  %v1089_v14 = vsub.f32 1.0, %v1088_v4  ;;  %v1099_v21 = vor.u32 1.1754944e-38, %v1098_v38  ;;  %vm1124_vm6 = vmor %vm1122_vm4, %vm1123_vm1 }
 0x26c   : > { %v1134_v30 = vmul.f32 1.0614054, %v1115_v58  ;;  %v1119_v59 = vsub.f32 1.0, %v1118_v15  ;;  %v1173_v1 = vmul.f32 %v1169_v60, %v1991_v28  ;;  %1535 = vpow2.f32 %v1180_v56 }
 0x26d   : > { %v1136_v13 = vadd.f32 -1.4531521, %v1132_v34  ;;  %v1090_v39 = vmul.f32 %v1530_v7, %v1089_v14  ;;  %v1182_v15 = vmul.f32 1.442695, %v1175_v0  ;;  %v1058_v60 = vsel %vm1054_vm9, 1.0, %v1590_v22 }
 0x26e   : > { %v1138_v31 = vadd.f32 -1.4531521, %v1134_v30  ;;  %v1120_v41 = vmul.f32 %v1532_v8, %v1119_v59  ;;  %vm1055_vm11 = vcmp.ge.f32.partialorder %v1988_v26, 0.0  ;;  %v1046_v26 = vmul.f32 0.5, %v1970_v45 }
 0x26f   : > { %v1140_v33 = vmul.f32 %v1136_v13, %v2004_v5  ;;  %v1091_v42 = vadd.f32 %v1530_v7, %v1090_v39 }
 0x270   : > { %v1142_v49 = vmul.f32 %v1138_v31, %v1115_v58  ;;  %v1121_v48 = vadd.f32 %v1532_v8, %v1120_v41  ;;  %v1534_v31 = vpop.eup %1533 }
 0x271   : > { %v1144_v51 = vadd.f32 1.4214138, %v1140_v33  ;;  %v1095_v53 = vsel %vm1094_vm3, %v1530_v7, %v1091_v42 }
 0x272   : > { %v1146_v18 = vadd.f32 1.4214138, %v1142_v49  ;;  %v1100_v54 = vsel %vm1097_vm5, %v1099_v21, %v1095_v53  ;;  %v1125_v25 = vsel %vm1124_vm6, %v1532_v8, %v1121_v48  ;;  %v1178_v8 = vmul.f32 1.442695, %v1173_v1  ;;  %v1536_v28 = vpop.eup %1535 }
 0x273   : > { %v1148_v9 = vmul.f32 %v1144_v51, %v2004_v5  ;;  %v1133_v61 = vmul.f32 1.0614054, %v1100_v54  ;;  %v1130_v23 = vsel %vm1127_vm7, %v1129_v35, %v1125_v25  ;;  %v1056_v51 = vsel %vm1052_vm8, 1.0, %v1590_v22 }
 0x274   : > { %v1150_v52 = vmul.f32 %v1146_v18, %v1115_v58  ;;  %v1135_v27 = vmul.f32 1.0614054, %v1130_v23  ;;  %1537 = vpow2.f32 %v1178_v8  ;;  %v1059_v35 = vsel %vm1055_vm11, 1.0, %v1590_v22 }
 0x275   : > { %v1152_v57 = vadd.f32 -0.28449672, %v1148_v9  ;;  %v1137_v47 = vadd.f32 -1.4531521, %v1133_v61  ;;  %1539 = vpow2.f32 %v1182_v15 }
 0x276   : > { %v1154_v29 = vadd.f32 -0.28449672, %v1150_v52  ;;  %v1139_v2 = vadd.f32 -1.4531521, %v1135_v27  ;;  %v1047_v27 = vmul.f32 0.5, %v1982_v19 }
 0x277   : > { %v1156_v32 = vmul.f32 %v1152_v57, %v2004_v5  ;;  %v1141_v55 = vmul.f32 %v1137_v47, %v1100_v54 }
 0x278   : > { %v1158_v50 = vmul.f32 %v1154_v29, %v1115_v58  ;;  %v1143_v6 = vmul.f32 %v1139_v2, %v1130_v23 }
 0x279   : > { %v1160_v63 = vadd.f32 0.2548296, %v1156_v32  ;;  %v1145_v34 = vadd.f32 1.4214138, %v1141_v55 }
 0x27a   : > { %v1162_v44 = vadd.f32 0.2548296, %v1158_v50  ;;  %v1147_v30 = vadd.f32 1.4214138, %v1143_v6  ;;  %v1538_v43 = vpop.eup %1537 }
 0x27b   : > { %v1164_v7 = vmul.f32 %v1160_v63, %v2004_v5  ;;  %v1149_v13 = vmul.f32 %v1145_v34, %v1100_v54  ;;  %v1540_v24 = vpop.eup %1539 }
 0x27c   : > { %v1166_v4 = vmul.f32 %v1162_v44, %v1115_v58  ;;  %v1151_v40 = vmul.f32 %v1147_v30, %v1130_v23 }
 0x27d   : > { %v1184_v16 = vmul.f32 %v1534_v31, %v1164_v7  ;;  %v1153_v14 = vadd.f32 -0.28449672, %v1149_v13 }
 0x27e   : > { %v1155_v33 = vadd.f32 -0.28449672, %v1151_v40  ;;  %v1186_v11 = vmul.f32 %v1536_v28, %v1166_v4 }
 0x27f   : > { %v1157_v38 = vmul.f32 %v1153_v14, %v1100_v54  ;;  %v1188_v5 = vsub.f32 1.0, %v1184_v16 }
 0x280   : > { %v1159_v46 = vmul.f32 %v1155_v33, %v1130_v23  ;;  %v1190_v58 = vsub.f32 1.0, %v1186_v11 }
 0x281   : > { %v1161_v59 = vadd.f32 0.2548296, %v1157_v38  ;;  %v1192_v18 = vmul.f32 %v1188_v5, %v1056_v51 }
 0x282   : > { %v1163_v49 = vadd.f32 0.2548296, %v1159_v46  ;;  %v1194_v9 = vmul.f32 %v1190_v58, %v1058_v60 }
 0x283   : > { %v1165_v39 = vmul.f32 %v1161_v59, %v1100_v54  ;;  %v1196_v52 = vadd.f32 1.0, %v1192_v18  ;;  %v1044_v54 = vmul.f32 0.5, %v1968_v17 }
 0x284   : > { %v1167_v41 = vmul.f32 %v1163_v49, %v1130_v23  ;;  %v1198_v25 = vadd.f32 1.0, %v1194_v9 }
 0x285   : > { %v1185_v42 = vmul.f32 %v1538_v43, %v1165_v39  ;;  %v1200_v61 = vmul.f32 %v1196_v52, %v1044_v54  ;;  %v1247_v43 = vperm.slane %v1847_v3, 4 }
 0x286   : > { %v1187_v36 = vmul.f32 %v1540_v24, %v1167_v41  ;;  %v1202_v32 = vmul.f32 %v1198_v25, %v1046_v26  ;;  %v1252_v41 = vperm.slane %v1847_v3, 5 }
 0x287   : > { %v1189_v21 = vsub.f32 1.0, %v1185_v42 }
 0x288   : > { %v1191_v48 = vsub.f32 1.0, %v1187_v36 }
 0x289   : > { %v1193_v53 = vmul.f32 %v1189_v21, %v1057_v37 }
 0x28a   : > { %v1195_v57 = vmul.f32 %v1191_v48, %v1059_v35 }
 0x28b   : > { %v1197_v29 = vadd.f32 1.0, %v1193_v53 }
 0x28c   : > { %v1199_v62 = vadd.f32 1.0, %v1195_v57 }
 0x28d   : > { %v1201_v23 = vmul.f32 %v1197_v29, %v1045_v20 }
 0x28e   : > { %v1203_v50 = vmul.f32 %v1199_v62, %v1047_v27 }
 0x28f   : > { %v1204_v56 = vadd.f32 %v1201_v23, %v1200_v61 }
 0x291   : > { %v1205_v47 = vadd.f32 %v1204_v56, %v1202_v32 }
 0x293   : > { %v1206_v63 = vadd.f32 %v1205_v47, %v1203_v50 }
 0x295   : > { %v1207_v22 = vrot.slane %v1206_v63, 4 }
 0x297   : > { %v1208_v1 = vadd.f32 %v1207_v22, %v1206_v63 }
 0x299   : > { %v1209_v2 = vrot.slane %v1208_v1, 2 }
 0x29b   : > { %v1210_v17 = vadd.f32 %v1209_v2, %v1208_v1 }
 0x29d   : > { %v1211_v44 = vrot.slane %v1210_v17, 1 }
 0x29f   : > { %v1212_v55 = vadd.f32 %v1211_v44, %v1210_v17 }
 0x2a1   : > { %v1213_v12 = vmul.f32 %v1212_v55, %v1957_v10 }
 0x2a3   : > { %v1214_v0 = vsub.f32 %v1200_v61, %v1213_v12  ;;  %v1215_v6 = vsub.f32 %v1201_v23, %v1213_v12  ;;  %v1216_v45 = vsub.f32 %v1202_v32, %v1213_v12  ;;  %v1217_v7 = vsub.f32 %v1203_v50, %v1213_v12 }
 0x2a5   : > { %v1218_v34 = vmul.f32 %v1214_v0, %v1214_v0  ;;  %v1219_v8 = vmul.f32 %v1215_v6, %v1215_v6  ;;  %v1220_v30 = vmul.f32 %v1216_v45, %v1216_v45  ;;  %v1221_v19 = vmul.f32 %v1217_v7, %v1217_v7 }
 0x2a7   : > { %v1222_v4 = vadd.f32 %v1219_v8, %v1218_v34 }
 0x2a9   : > { %v1223_v13 = vadd.f32 %v1222_v4, %v1220_v30 }
 0x2ab   : > { %v1224_v15 = vadd.f32 %v1223_v13, %v1221_v19 }
 0x2ad   : > { %v1225_v31 = vrot.slane %v1224_v15, 4 }
 0x2af   : > { %v1226_v40 = vadd.f32 %v1225_v31, %v1224_v15 }
 0x2b1   : > { %v1227_v16 = vrot.slane %v1226_v40, 2 }
 0x2b3   : > { %v1228_v14 = vadd.f32 %v1227_v16, %v1226_v40 }
 0x2b5   : > { %v1229_v28 = vrot.slane %v1228_v14, 1 }
 0x2b7   : > { %v1230_v33 = vadd.f32 %v1229_v28, %v1228_v14 }
 0x2b9   : > { %v1231_v11 = vmul.f32 %v1230_v33, %v1957_v10 }
 0x2bb   : > { %v1232_v38 = vadd.f32 1e-05, %v1231_v11 }
 0x2bd   : > { %1541 = vrsqrt.f32 %v1232_v38  ;;  %vm1239_vm13 = vweird.f32 %v1232_v38 }
 0x2c3   : > { %v1542_v46 = vpop.eup %1541 }
 0x2c4   : > { %v1234_v5 = vmul.f32 %v1542_v46, %v1232_v38  ;;  %vm1240_vm12 = vweird.f32 %v1542_v46 }
 0x2c5   : > { %vm1241_vm14 = vmor %vm1239_vm13, %vm1240_vm12 }
 0x2c6   : > { %v1235_v59 = vmul.f32 %v1542_v46, %v1234_v5 }
 0x2c8   : > { %v1236_v49 = vmul.f32 0.5, %v1235_v59 }
 0x2ca   : > { %v1237_v58 = vsub.f32 1.5, %v1236_v49 }
 0x2cc   : > { %v1238_v39 = vmul.f32 %v1542_v46, %v1237_v58 }
 0x2ce   : > { %v1242_v51 = vsel %vm1241_vm14, %v1542_v46, %v1238_v39 }
 0x2cf   : > { %v1243_v24 = vmul.f32 %v1242_v51, %v1214_v0  ;;  %v1244_v18 = vmul.f32 %v1242_v51, %v1215_v6  ;;  %v1245_v42 = vmul.f32 %v1242_v51, %v1216_v45  ;;  %v1246_v10 = vmul.f32 %v1242_v51, %v1217_v7 }
 0x2d1   : > { %v1248_v60 = vmul.f32 %v1247_v43, %v1243_v24  ;;  %v1249_v36 = vmul.f32 %v1247_v43, %v1244_v18  ;;  %v1250_v9 = vmul.f32 %v1247_v43, %v1245_v42  ;;  %v1251_v21 = vmul.f32 %v1247_v43, %v1246_v10 }
 0x2d3   : > { %v1253_v37 = vadd.f32 %v1252_v41, %v1248_v60  ;;  %v1254_v48 = vadd.f32 %v1252_v41, %v1249_v36  ;;  %v1255_v52 = vadd.f32 %v1252_v41, %v1250_v9  ;;  %v1256_v53 = vadd.f32 %v1252_v41, %v1251_v21 }
 0x2d4   : > { %1264 = sbr.rel (%p1432_p5) target bundleno = 750 (0x2ee), region = 67 }
 0x2d5   : > { %1257 = vst [vmem:[#allocation2 + $0x20] sm:$0xff] %v1253_v37 }
 0x2d6   : > { %1258 = vst [vmem:[#allocation2 + $0x8] sm:$0xff] %v1254_v48 }
 0x2d7   : > { %1259 = vst [vmem:[#allocation2 + $0x10] sm:$0xff] %v1255_v52 }
 0x2d8   : > { %1260 = vst [vmem:[#allocation2 + $0x30] sm:$0xff] %v1256_v53 }
 0x2d9   : > { %v1265_v3 = vadd.f32 %v1254_v48, %v1253_v37  ;;  %v1272_v35 = vadd.f32 %v1256_v53, %v1255_v52  ;;  %v1592_v57 = vmov 16.0   ;;  %vm1290_vm0 = vcmask 1041409  }
 0x2da   : > { %1543 = vrcp.f32 %v1592_v57 }
 0x2db   : > { %v1266_v54 = vrot.slane %v1265_v3, 4  ;;  %v1273_v25 = vrot.slane %v1272_v35, 4 }
 0x2dd   : > { %v1267_v20 = vadd.f32 %v1266_v54, %v1265_v3  ;;  %v1274_v29 = vadd.f32 %v1273_v25, %v1272_v35 }
 0x2df   : > { %v1268_v61 = vrot.slane %v1267_v20, 2  ;;  %v1275_v26 = vrot.slane %v1274_v29, 2 }
 0x2e0   : > { %v1544_v23 = vpop.eup %1543 }
 0x2e1   : > { %v1269_v62 = vadd.f32 %v1268_v61, %v1267_v20  ;;  %v1276_v32 = vadd.f32 %v1275_v26, %v1274_v29  ;;  %v1280_v56 = vmul.f32 16.0, %v1544_v23  ;;  %vm1284_vm15 = vweird.f32 %v1544_v23 }
 0x2e3   : > { %v1270_v27 = vrot.slane %v1269_v62, 1  ;;  %v1277_v50 = vrot.slane %v1276_v32, 1  ;;  %v1281_v47 = vsub.f32 1.0, %v1280_v56 }
 0x2e5   : > { %v1282_v63 = vmul.f32 %v1544_v23, %v1281_v47  ;;  %v1271_v22 = vadd.f32 %v1270_v27, %v1269_v62  ;;  %v1278_v1 = vadd.f32 %v1277_v50, %v1276_v32 }
 0x2e7   : > { %v1283_v2 = vadd.f32 %v1544_v23, %v1282_v63 }
 0x2e9   : > { %v1285_v17 = vsel %vm1284_vm15, %v1544_v23, %v1283_v2 }
 0x2ea   : > { %v1286_v44 = vmul.f32 %v1285_v17, %v1271_v22  ;;  %v1287_v55 = vmul.f32 %v1285_v17, %v1278_v1 }
 0x2ec   : > { %v1291_v12 = vsel %vm1290_vm0, %v1287_v55, %v1286_v44 }
 0x2ed   : > { %1293 = vst [vmem:[#allocation5] sm:$0x3] %v1291_v12 }
 0x2ee PF: > { %p1464_p6 = scmp.eq.s32.totalorder %s1635_s22, 1  ;;  %s1593_s26 = smov [#allocation5]  }
 0x2ef   : > { %s1300_s27 = sshll.u32 %s1593_s26, 4  ;;  %s1302_s30 = sshll.u32 %s2053_s6, 4  ;;  %s1301_s27 = int_to_ptr.vmem [resolvable:$true] %s1300_s27  ;;  %s1303_s30 = int_to_ptr.hbm [resolvable:$true] %s1302_s30 }
 0x2f0   : > { %1461 = dma.vmem_to_hbm [thread:$0]  (%p1464_p6), %s1301_s27, 32, %s1303_s30, [#allocation6]  }
 0x2f1   : > { %1580 = dma.done.wait (%p1464_p6), [#allocation6], 32  }
 0x2f2   : > { %1582 = vsyncadd (%p1464_p6), [#allocation6], 4294967264 }
 0x2f3 PF: > { %s17_s21 = sadd.s32 1, %s1585_s21  }
 0x2f4   : > { %p14_p7 = scmp.ge.s32.totalorder %s17_s21, 4  }
 0x2f6   :  { %16 = sbr.rel (!%p14_p7) target bundleno = 1 (0x1), region = 104 }
 0x2fb   :  { %1316 = vsyncpa [#allocation6], 1 }
 0x2fc   :  { %1318 = vsyncpa [#allocation6 + $0x1], 1 }
 0x2fd   :  { %1319 = vsyncmov [#allocation4] }
 0x300   :  { %s1320_s22 = vpop.sfrf %1319 }
 0x301   :  { %p1437_p8 = scmp.ne.s32.totalorder %s1320_s22, 0 }
 0x303   :  { %1324 = shalt.err (%p1437_p8)  }

</bundles_post_ra>
